<compile_context>
chip_gen: v7x
topology: tpu7x:2x2x1
jax: 0.10.0
libtpu: 0.0.40
codegen_flags: <defaults>
</compile_context>

<pallas_src>
import jax
import jax.numpy as jnp
import numpy as np
from jax.experimental import pallas as pl
from jax.experimental.pallas import tpu as pltpu


def lstm_kernel(x_ref, wih_ref, whh_ref, b_ref, wlin_ref, blin_ref,
                out_ref, xwi_ref):
    """Full LSTM unroll + final linear projection, entirely in VMEM.

    x_ref    : (T, input_size)     input sequence (f32)
    wih_ref  : (input_size, 4*GP)  W_ih^T, gate order [i,f,o,g], gate-padded (f32)
    whh_ref  : (GP, 4*GP)          W_hh^T, same column layout, rows H:GP zero (bf16)
    b_ref    : (1, 4*GP)           b_ih + b_hh, padded/reordered the same way (f32)
    wlin_ref : (1, GP) or (GP, O)  linear weight; (1, GP) lane-dense layout when O==1
    blin_ref : (1, O)              linear bias
    out_ref  : (1, O)              prediction at the last time step
    xwi_ref  : (T, 4*GP)           VMEM scratch: input contribution + bias, all steps
    """
    T = x_ref.shape[0]
    GP = whh_ref.shape[0]  # padded per-gate lane slot (multiple of 128)

    # Input contribution for all time steps + fused bias, computed once.
    # input_size == 1  ->  pure VPU broadcast FMA (no degenerate K=1 matmul).
    if x_ref.shape[1] == 1:
        xwi_ref[...] = x_ref[...] * wih_ref[...] + b_ref[...]
    else:
        xwi_ref[...] = (jnp.dot(x_ref[...], wih_ref[...],
                                preferred_element_type=jnp.float32)
                        + b_ref[...])

    def step(t, carry):
        h, c = carry                                               # (1, GP) f32 each
        # bf16 x bf16 -> f32 MXU matmul (weight bytes halved vs f32 operands).
        gates = (xwi_ref[pl.ds(t, 1), :]
                 + jnp.dot(h.astype(jnp.bfloat16), whh_ref[...],
                           preferred_element_type=jnp.float32))    # (1, 4*GP) f32
        # Gate order [i | f | o | g]: one EUP sigmoid over the 3 contiguous
        # sigmoid gates, one tanh for the candidate. All slices lane-aligned.
        sig = jax.nn.sigmoid(gates[:, 0:3 * GP])
        i = sig[:, 0:GP]
        f = sig[:, GP:2 * GP]
        o = sig[:, 2 * GP:3 * GP]
        g = jnp.tanh(gates[:, 3 * GP:4 * GP])
        c_new = f * c + i * g
        h_new = o * jnp.tanh(c_new)
        return (h_new, c_new)

    h0 = jnp.zeros((1, GP), jnp.float32)
    c0 = jnp.zeros((1, GP), jnp.float32)
    # T is small and static -> fully unroll so adjacent steps' work can co-issue.
    h_final, _ = jax.lax.fori_loop(0, T, step, (h0, c0), unroll=True)

    # Head: pred[-1] = Linear(h_T).  Padded lanes of h are exactly zero so the
    # zero pad lanes/rows of wlin contribute nothing.
    if wlin_ref.shape == (1, GP):
        # out_size == 1: lane-dense VPU multiply + lane reduction, no MXU pass.
        out_ref[...] = (jnp.sum(h_final * wlin_ref[...], axis=-1, keepdims=True)
                        + blin_ref[...])
    else:
        out_ref[...] = (jnp.dot(h_final, wlin_ref[...],
                                preferred_element_type=jnp.float32)
                        + blin_ref[...])


def init_params(key, input_size=1, hidden_size=50, out_size=1):
    """PyTorch-style uniform(-1/sqrt(H), 1/sqrt(H)) init, PyTorch weight layouts."""
    ks = jax.random.split(key, 6)
    bound = 1.0 / np.sqrt(hidden_size)
    u = lambda k, shape: jax.random.uniform(k, shape, jnp.float32, -bound, bound)
    return {
        "w_ih": u(ks[0], (4 * hidden_size, input_size)),   # gate order [i, f, g, o]
        "w_hh": u(ks[1], (4 * hidden_size, hidden_size)),
        "b_ih": u(ks[2], (4 * hidden_size,)),
        "b_hh": u(ks[3], (4 * hidden_size,)),
        "w_lin": u(ks[4], (out_size, hidden_size)),
        "b_lin": u(ks[5], (out_size,)),
    }


def _prep_weights(params, hidden_size, out_size, gp):
    """Transpose, reorder gates to [i,f,o,g], pad each gate to gp lanes, cast W_hh bf16."""
    H = hidden_size
    w_ih = params["w_ih"]                       # (4H, in)
    w_hh = params["w_hh"]                       # (4H, H)
    bias = params["b_ih"] + params["b_hh"]      # (4H,)

    def split(a):  # PyTorch gate order: i, f, g, o
        return a[0:H], a[H:2 * H], a[2 * H:3 * H], a[3 * H:4 * H]

    wi_i, wi_f, wi_g, wi_o = split(w_ih)
    wh_i, wh_f, wh_g, wh_o = split(w_hh)
    b_i, b_f, b_g, b_o = split(bias)

    def pad_cols(a_t):  # (X, H) -> (X, gp), zero pad lanes H:gp
        return jnp.pad(a_t, ((0, 0), (0, gp - H)))

    # Reordered to [i, f, o, g].
    wih_t = jnp.concatenate([pad_cols(w.T) for w in (wi_i, wi_f, wi_o, wi_g)],
                            axis=1)                               # (in, 4*gp) f32
    whh_t = jnp.concatenate([pad_cols(w.T) for w in (wh_i, wh_f, wh_o, wh_g)],
                            axis=1)                               # (H, 4*gp)
    whh_t = jnp.pad(whh_t, ((0, gp - H), (0, 0)))                 # (gp, 4*gp)
    whh_t = whh_t.astype(jnp.bfloat16)                            # MXU-native operand
    b_packed = jnp.concatenate(
        [jnp.pad(v, (0, gp - H)) for v in (b_i, b_f, b_o, b_g)]
    ).reshape(1, 4 * gp)                                          # (1, 4*gp) f32

    if out_size == 1:
        # Lane-dense head layout for the VPU reduce path.
        wlin_p = jnp.pad(params["w_lin"], ((0, 0), (0, gp - H)))  # (1, gp)
    else:
        wlin_p = jnp.pad(params["w_lin"].T, ((0, gp - H), (0, 0)))  # (gp, out)
    blin = params["b_lin"].reshape(1, out_size)                   # (1, out)
    return wih_t, whh_t, b_packed, wlin_p, blin


def prepare_weights(params):
    """One-time weight packing; cache the result and reuse across forward calls."""
    hidden_size = params["w_hh"].shape[1]
    out_size = params["w_lin"].shape[0]
    gp = max(128, ((hidden_size + 127) // 128) * 128)   # per-gate lane slot
    wih_t, whh_t, b_packed, wlin_p, blin = _prep_weights(
        params, hidden_size, out_size, gp)
    return {"wih": wih_t, "whh": whh_t, "b": b_packed,
            "wlin": wlin_p, "blin": blin}


@jax.jit
def lstm_forward_prepped(seq, prepped):
    """Equivalent of LSTM.forward(seq) -> pred[-1], shape (out_size,)."""
    seq = jnp.asarray(seq, jnp.float32)
    input_size = prepped["wih"].shape[0]
    gp = prepped["whh"].shape[0]
    out_size = prepped["blin"].shape[1]
    x = seq.reshape(-1, input_size)
    T = x.shape[0]

    vmem_spec = pl.BlockSpec(memory_space=pltpu.MemorySpace.VMEM)
    out = pl.pallas_call(
        lstm_kernel,
        out_shape=jax.ShapeDtypeStruct((1, out_size), jnp.float32),
        in_specs=[vmem_spec] * 6,
        out_specs=vmem_spec,
        scratch_shapes=[pltpu.VMEM((T, 4 * gp), jnp.float32)],
    )(x, prepped["wih"], prepped["whh"], prepped["b"],
      prepped["wlin"], prepped["blin"])
    return out[0]                                               # (out_size,)


def lstm_forward(seq, params):
    """Convenience path: pack weights then run the kernel (prefer prepare_weights
    + lstm_forward_prepped for repeated inference)."""
    return lstm_forward_prepped(seq, prepare_weights(params))


def lstm_forward_ref(seq, params):
    """Pure-JAX f32 reference (original PyTorch layout / gate order)."""
    seq = jnp.asarray(seq, jnp.float32)
    input_size = params["w_ih"].shape[1]
    H = params["w_hh"].shape[1]
    x = seq.reshape(-1, input_size)
    T = x.shape[0]
    h = jnp.zeros((1, H), jnp.float32)
    c = jnp.zeros((1, H), jnp.float32)
    for t in range(T):
        gates = (x[t:t + 1] @ params["w_ih"].T + params["b_ih"]
                 + h @ params["w_hh"].T + params["b_hh"])
        i = jax.nn.sigmoid(gates[:, 0:H])
        f = jax.nn.sigmoid(gates[:, H:2 * H])
        g = jnp.tanh(gates[:, 2 * H:3 * H])
        o = jax.nn.sigmoid(gates[:, 3 * H:4 * H])
        c = f * c + i * g
        h = o * jnp.tanh(c)
    return (h @ params["w_lin"].T + params["b_lin"])[0]


if __name__ == "__main__":
    key = jax.random.PRNGKey(0)
    k_param, k_seq = jax.random.split(key)

    input_size, hidden_size, out_size = 1, 50, 1
    seq_len = 8
    params = init_params(k_param, input_size, hidden_size, out_size)
    seq = jax.random.normal(k_seq, (seq_len,), jnp.float32)

    # Pack weights once (hoisted out of the per-call path), then run the kernel.
    prepped = prepare_weights(params)
    pred = lstm_forward_prepped(seq, prepped)
    jax.block_until_ready(pred)

    ref = lstm_forward_ref(seq, params)
    # bf16 recurrent-weight operands -> loosened tolerance vs the f32 reference.
    np.testing.assert_allclose(np.asarray(pred), np.asarray(ref),
                               rtol=2e-2, atol=2e-2)
    print("KERNEL_OK")
</pallas_src>

<mosaic_0001>
module attributes {stable_mosaic.version = 11 : i64} {
  func.func @lstm_kernel(%arg0: memref<8x1xf32, #tpu.memory_space<vmem>>, %arg1: memref<1x512xf32, #tpu.memory_space<vmem>>, %arg2: memref<128x512xbf16, #tpu.memory_space<vmem>>, %arg3: memref<1x512xf32, #tpu.memory_space<vmem>>, %arg4: memref<1x128xf32, #tpu.memory_space<vmem>>, %arg5: memref<1x1xf32, #tpu.memory_space<vmem>>, %arg6: memref<1x1xf32, #tpu.memory_space<vmem>>, %arg7: memref<8x512xf32, #tpu.memory_space<vmem>>) attributes {dimension_semantics = [], scalar_prefetch = 0 : i64, scratch_operands = 1 : i64, tpu.core_type = #tpu.core_type<tc>} {
    %c0 = arith.constant 0 : index
    %c0_0 = arith.constant 0 : index
    %0 = vector.load %arg0[%c0, %c0_0] : memref<8x1xf32, #tpu.memory_space<vmem>>, vector<8x1xf32>
    %c0_1 = arith.constant 0 : index
    %c0_2 = arith.constant 0 : index
    %1 = vector.load %arg1[%c0_1, %c0_2] : memref<1x512xf32, #tpu.memory_space<vmem>>, vector<1x512xf32>
    %2 = vector.broadcast %0 : vector<8x1xf32> to vector<8x512xf32>
    %3 = vector.broadcast %1 : vector<1x512xf32> to vector<8x512xf32>
    %4 = arith.mulf %2, %3 : vector<8x512xf32>
    %c0_3 = arith.constant 0 : index
    %c0_4 = arith.constant 0 : index
    %5 = vector.load %arg3[%c0_3, %c0_4] : memref<1x512xf32, #tpu.memory_space<vmem>>, vector<1x512xf32>
    %6 = vector.broadcast %5 : vector<1x512xf32> to vector<8x512xf32>
    %7 = arith.addf %4, %6 : vector<8x512xf32>
    %c0_5 = arith.constant 0 : index
    %c0_6 = arith.constant 0 : index
    %8 = vector.load %arg7[%c0_5, %c0_6] : memref<8x512xf32, #tpu.memory_space<vmem>>, vector<8x512xf32>
    tpu.vector_store %arg7[%c0_5, %c0_6], %7 {strides = array<i32>} : memref<8x512xf32, #tpu.memory_space<vmem>>, vector<8x512xf32>,
    %cst = arith.constant 0.000000e+00 : f32
    %9 = vector.broadcast %cst : f32 to vector<1x128xf32>
    %cst_7 = arith.constant 0.000000e+00 : f32
    %10 = vector.broadcast %cst_7 : f32 to vector<1x128xf32>
    %c0_i32 = arith.constant 0 : i32
    %11 = arith.index_cast %c0_i32 : i32 to index
    %c0_8 = arith.constant 0 : index
    %12 = vector.load %arg7[%11, %c0_8] : memref<8x512xf32, #tpu.memory_space<vmem>>, vector<1x512xf32>
    %13 = arith.truncf %9 : vector<1x128xf32> to vector<1x128xbf16>
    %c0_9 = arith.constant 0 : index
    %c0_10 = arith.constant 0 : index
    %14 = vector.load %arg2[%c0_9, %c0_10] : memref<128x512xbf16, #tpu.memory_space<vmem>>, vector<128x512xbf16>
    %cst_11 = arith.constant dense<0.000000e+00> : vector<1x512xf32>
    %15 = tpu.matmul %13, %14, %cst_11 {dimension_numbers = #tpu.dot_dimension_numbers<[1], [0], [0], [1], [0, 0, 1, 1], [], []>} : vector<1x128xbf16>, vector<128x512xbf16>, vector<1x512xf32> -> vector<1x512xf32>
    %16 = arith.addf %12, %15 : vector<1x512xf32>
    %17 = vector.extract_strided_slice %16 {offsets = [0, 0], sizes = [1, 384], strides = [1, 1]} : vector<1x512xf32> to vector<1x384xf32>
    %18 = arith.negf %17 : vector<1x384xf32>
    %19 = math.exp %18 : vector<1x384xf32>
    %cst_12 = arith.constant 1.000000e+00 : f32
    %20 = vector.broadcast %cst_12 : f32 to vector<1x384xf32>
    %21 = arith.addf %20, %19 : vector<1x384xf32>
    %22 = arith.divf %20, %21 : vector<1x384xf32>
    %23 = vector.extract_strided_slice %22 {offsets = [0, 0], sizes = [1, 128], strides = [1, 1]} : vector<1x384xf32> to vector<1x128xf32>
    %24 = vector.extract_strided_slice %22 {offsets = [0, 128], sizes = [1, 128], strides = [1, 1]} : vector<1x384xf32> to vector<1x128xf32>
    %25 = vector.extract_strided_slice %22 {offsets = [0, 256], sizes = [1, 128], strides = [1, 1]} : vector<1x384xf32> to vector<1x128xf32>
    %26 = vector.extract_strided_slice %16 {offsets = [0, 384], sizes = [1, 128], strides = [1, 1]} : vector<1x512xf32> to vector<1x128xf32>
    %27 = math.tanh %26 : vector<1x128xf32>
    %28 = arith.mulf %24, %10 : vector<1x128xf32>
    %29 = arith.mulf %23, %27 : vector<1x128xf32>
    %30 = arith.addf %28, %29 : vector<1x128xf32>
    %31 = math.tanh %30 : vector<1x128xf32>
    %32 = arith.mulf %25, %31 : vector<1x128xf32>
    %c1_i32 = arith.constant 1 : i32
    %33 = arith.index_cast %c1_i32 : i32 to index
    %c0_13 = arith.constant 0 : index
    %34 = vector.load %arg7[%33, %c0_13] : memref<8x512xf32, #tpu.memory_space<vmem>>, vector<1x512xf32>
    %35 = arith.truncf %32 : vector<1x128xf32> to vector<1x128xbf16>
    %c0_14 = arith.constant 0 : index
    %c0_15 = arith.constant 0 : index
    %36 = vector.load %arg2[%c0_14, %c0_15] : memref<128x512xbf16, #tpu.memory_space<vmem>>, vector<128x512xbf16>
    %cst_16 = arith.constant dense<0.000000e+00> : vector<1x512xf32>
    %37 = tpu.matmul %35, %36, %cst_16 {dimension_numbers = #tpu.dot_dimension_numbers<[1], [0], [0], [1], [0, 0, 1, 1], [], []>} : vector<1x128xbf16>, vector<128x512xbf16>, vector<1x512xf32> -> vector<1x512xf32>
    %38 = arith.addf %34, %37 : vector<1x512xf32>
    %39 = vector.extract_strided_slice %38 {offsets = [0, 0], sizes = [1, 384], strides = [1, 1]} : vector<1x512xf32> to vector<1x384xf32>
    %40 = arith.negf %39 : vector<1x384xf32>
    %41 = math.exp %40 : vector<1x384xf32>
    %cst_17 = arith.constant 1.000000e+00 : f32
    %42 = vector.broadcast %cst_17 : f32 to vector<1x384xf32>
    %43 = arith.addf %42, %41 : vector<1x384xf32>
    %44 = arith.divf %42, %43 : vector<1x384xf32>
    %45 = vector.extract_strided_slice %44 {offsets = [0, 0], sizes = [1, 128], strides = [1, 1]} : vector<1x384xf32> to vector<1x128xf32>
    %46 = vector.extract_strided_slice %44 {offsets = [0, 128], sizes = [1, 128], strides = [1, 1]} : vector<1x384xf32> to vector<1x128xf32>
    %47 = vector.extract_strided_slice %44 {offsets = [0, 256], sizes = [1, 128], strides = [1, 1]} : vector<1x384xf32> to vector<1x128xf32>
    %48 = vector.extract_strided_slice %38 {offsets = [0, 384], sizes = [1, 128], strides = [1, 1]} : vector<1x512xf32> to vector<1x128xf32>
    %49 = math.tanh %48 : vector<1x128xf32>
    %50 = arith.mulf %46, %30 : vector<1x128xf32>
    %51 = arith.mulf %45, %49 : vector<1x128xf32>
    %52 = arith.addf %50, %51 : vector<1x128xf32>
    %53 = math.tanh %52 : vector<1x128xf32>
    %54 = arith.mulf %47, %53 : vector<1x128xf32>
    %c2_i32 = arith.constant 2 : i32
    %55 = arith.index_cast %c2_i32 : i32 to index
    %c0_18 = arith.constant 0 : index
    %56 = vector.load %arg7[%55, %c0_18] : memref<8x512xf32, #tpu.memory_space<vmem>>, vector<1x512xf32>
    %57 = arith.truncf %54 : vector<1x128xf32> to vector<1x128xbf16>
    %c0_19 = arith.constant 0 : index
    %c0_20 = arith.constant 0 : index
    %58 = vector.load %arg2[%c0_19, %c0_20] : memref<128x512xbf16, #tpu.memory_space<vmem>>, vector<128x512xbf16>
    %cst_21 = arith.constant dense<0.000000e+00> : vector<1x512xf32>
    %59 = tpu.matmul %57, %58, %cst_21 {dimension_numbers = #tpu.dot_dimension_numbers<[1], [0], [0], [1], [0, 0, 1, 1], [], []>} : vector<1x128xbf16>, vector<128x512xbf16>, vector<1x512xf32> -> vector<1x512xf32>
    %60 = arith.addf %56, %59 : vector<1x512xf32>
    %61 = vector.extract_strided_slice %60 {offsets = [0, 0], sizes = [1, 384], strides = [1, 1]} : vector<1x512xf32> to vector<1x384xf32>
    %62 = arith.negf %61 : vector<1x384xf32>
    %63 = math.exp %62 : vector<1x384xf32>
    %cst_22 = arith.constant 1.000000e+00 : f32
    %64 = vector.broadcast %cst_22 : f32 to vector<1x384xf32>
    %65 = arith.addf %64, %63 : vector<1x384xf32>
    %66 = arith.divf %64, %65 : vector<1x384xf32>
    %67 = vector.extract_strided_slice %66 {offsets = [0, 0], sizes = [1, 128], strides = [1, 1]} : vector<1x384xf32> to vector<1x128xf32>
    %68 = vector.extract_strided_slice %66 {offsets = [0, 128], sizes = [1, 128], strides = [1, 1]} : vector<1x384xf32> to vector<1x128xf32>
    %69 = vector.extract_strided_slice %66 {offsets = [0, 256], sizes = [1, 128], strides = [1, 1]} : vector<1x384xf32> to vector<1x128xf32>
    %70 = vector.extract_strided_slice %60 {offsets = [0, 384], sizes = [1, 128], strides = [1, 1]} : vector<1x512xf32> to vector<1x128xf32>
    %71 = math.tanh %70 : vector<1x128xf32>
    %72 = arith.mulf %68, %52 : vector<1x128xf32>
    %73 = arith.mulf %67, %71 : vector<1x128xf32>
    %74 = arith.addf %72, %73 : vector<1x128xf32>
    %75 = math.tanh %74 : vector<1x128xf32>
    %76 = arith.mulf %69, %75 : vector<1x128xf32>
    %c3_i32 = arith.constant 3 : i32
    %77 = arith.index_cast %c3_i32 : i32 to index
    %c0_23 = arith.constant 0 : index
    %78 = vector.load %arg7[%77, %c0_23] : memref<8x512xf32, #tpu.memory_space<vmem>>, vector<1x512xf32>
    %79 = arith.truncf %76 : vector<1x128xf32> to vector<1x128xbf16>
    %c0_24 = arith.constant 0 : index
    %c0_25 = arith.constant 0 : index
    %80 = vector.load %arg2[%c0_24, %c0_25] : memref<128x512xbf16, #tpu.memory_space<vmem>>, vector<128x512xbf16>
    %cst_26 = arith.constant dense<0.000000e+00> : vector<1x512xf32>
    %81 = tpu.matmul %79, %80, %cst_26 {dimension_numbers = #tpu.dot_dimension_numbers<[1], [0], [0], [1], [0, 0, 1, 1], [], []>} : vector<1x128xbf16>, vector<128x512xbf16>, vector<1x512xf32> -> vector<1x512xf32>
    %82 = arith.addf %78, %81 : vector<1x512xf32>
    %83 = vector.extract_strided_slice %82 {offsets = [0, 0], sizes = [1, 384], strides = [1, 1]} : vector<1x512xf32> to vector<1x384xf32>
    %84 = arith.negf %83 : vector<1x384xf32>
    %85 = math.exp %84 : vector<1x384xf32>
    %cst_27 = arith.constant 1.000000e+00 : f32
    %86 = vector.broadcast %cst_27 : f32 to vector<1x384xf32>
    %87 = arith.addf %86, %85 : vector<1x384xf32>
    %88 = arith.divf %86, %87 : vector<1x384xf32>
    %89 = vector.extract_strided_slice %88 {offsets = [0, 0], sizes = [1, 128], strides = [1, 1]} : vector<1x384xf32> to vector<1x128xf32>
    %90 = vector.extract_strided_slice %88 {offsets = [0, 128], sizes = [1, 128], strides = [1, 1]} : vector<1x384xf32> to vector<1x128xf32>
    %91 = vector.extract_strided_slice %88 {offsets = [0, 256], sizes = [1, 128], strides = [1, 1]} : vector<1x384xf32> to vector<1x128xf32>
    %92 = vector.extract_strided_slice %82 {offsets = [0, 384], sizes = [1, 128], strides = [1, 1]} : vector<1x512xf32> to vector<1x128xf32>
    %93 = math.tanh %92 : vector<1x128xf32>
    %94 = arith.mulf %90, %74 : vector<1x128xf32>
    %95 = arith.mulf %89, %93 : vector<1x128xf32>
    %96 = arith.addf %94, %95 : vector<1x128xf32>
    %97 = math.tanh %96 : vector<1x128xf32>
    %98 = arith.mulf %91, %97 : vector<1x128xf32>
    %c4_i32 = arith.constant 4 : i32
    %99 = arith.index_cast %c4_i32 : i32 to index
    %c0_28 = arith.constant 0 : index
    %100 = vector.load %arg7[%99, %c0_28] : memref<8x512xf32, #tpu.memory_space<vmem>>, vector<1x512xf32>
    %101 = arith.truncf %98 : vector<1x128xf32> to vector<1x128xbf16>
    %c0_29 = arith.constant 0 : index
    %c0_30 = arith.constant 0 : index
    %102 = vector.load %arg2[%c0_29, %c0_30] : memref<128x512xbf16, #tpu.memory_space<vmem>>, vector<128x512xbf16>
    %cst_31 = arith.constant dense<0.000000e+00> : vector<1x512xf32>
    %103 = tpu.matmul %101, %102, %cst_31 {dimension_numbers = #tpu.dot_dimension_numbers<[1], [0], [0], [1], [0, 0, 1, 1], [], []>} : vector<1x128xbf16>, vector<128x512xbf16>, vector<1x512xf32> -> vector<1x512xf32>
    %104 = arith.addf %100, %103 : vector<1x512xf32>
    %105 = vector.extract_strided_slice %104 {offsets = [0, 0], sizes = [1, 384], strides = [1, 1]} : vector<1x512xf32> to vector<1x384xf32>
    %106 = arith.negf %105 : vector<1x384xf32>
    %107 = math.exp %106 : vector<1x384xf32>
    %cst_32 = arith.constant 1.000000e+00 : f32
    %108 = vector.broadcast %cst_32 : f32 to vector<1x384xf32>
    %109 = arith.addf %108, %107 : vector<1x384xf32>
    %110 = arith.divf %108, %109 : vector<1x384xf32>
    %111 = vector.extract_strided_slice %110 {offsets = [0, 0], sizes = [1, 128], strides = [1, 1]} : vector<1x384xf32> to vector<1x128xf32>
    %112 = vector.extract_strided_slice %110 {offsets = [0, 128], sizes = [1, 128], strides = [1, 1]} : vector<1x384xf32> to vector<1x128xf32>
    %113 = vector.extract_strided_slice %110 {offsets = [0, 256], sizes = [1, 128], strides = [1, 1]} : vector<1x384xf32> to vector<1x128xf32>
    %114 = vector.extract_strided_slice %104 {offsets = [0, 384], sizes = [1, 128], strides = [1, 1]} : vector<1x512xf32> to vector<1x128xf32>
    %115 = math.tanh %114 : vector<1x128xf32>
    %116 = arith.mulf %112, %96 : vector<1x128xf32>
    %117 = arith.mulf %111, %115 : vector<1x128xf32>
    %118 = arith.addf %116, %117 : vector<1x128xf32>
    %119 = math.tanh %118 : vector<1x128xf32>
    %120 = arith.mulf %113, %119 : vector<1x128xf32>
    %c5_i32 = arith.constant 5 : i32
    %121 = arith.index_cast %c5_i32 : i32 to index
    %c0_33 = arith.constant 0 : index
    %122 = vector.load %arg7[%121, %c0_33] : memref<8x512xf32, #tpu.memory_space<vmem>>, vector<1x512xf32>
    %123 = arith.truncf %120 : vector<1x128xf32> to vector<1x128xbf16>
    %c0_34 = arith.constant 0 : index
    %c0_35 = arith.constant 0 : index
    %124 = vector.load %arg2[%c0_34, %c0_35] : memref<128x512xbf16, #tpu.memory_space<vmem>>, vector<128x512xbf16>
    %cst_36 = arith.constant dense<0.000000e+00> : vector<1x512xf32>
    %125 = tpu.matmul %123, %124, %cst_36 {dimension_numbers = #tpu.dot_dimension_numbers<[1], [0], [0], [1], [0, 0, 1, 1], [], []>} : vector<1x128xbf16>, vector<128x512xbf16>, vector<1x512xf32> -> vector<1x512xf32>
    %126 = arith.addf %122, %125 : vector<1x512xf32>
    %127 = vector.extract_strided_slice %126 {offsets = [0, 0], sizes = [1, 384], strides = [1, 1]} : vector<1x512xf32> to vector<1x384xf32>
    %128 = arith.negf %127 : vector<1x384xf32>
    %129 = math.exp %128 : vector<1x384xf32>
    %cst_37 = arith.constant 1.000000e+00 : f32
    %130 = vector.broadcast %cst_37 : f32 to vector<1x384xf32>
    %131 = arith.addf %130, %129 : vector<1x384xf32>
    %132 = arith.divf %130, %131 : vector<1x384xf32>
    %133 = vector.extract_strided_slice %132 {offsets = [0, 0], sizes = [1, 128], strides = [1, 1]} : vector<1x384xf32> to vector<1x128xf32>
    %134 = vector.extract_strided_slice %132 {offsets = [0, 128], sizes = [1, 128], strides = [1, 1]} : vector<1x384xf32> to vector<1x128xf32>
    %135 = vector.extract_strided_slice %132 {offsets = [0, 256], sizes = [1, 128], strides = [1, 1]} : vector<1x384xf32> to vector<1x128xf32>
    %136 = vector.extract_strided_slice %126 {offsets = [0, 384], sizes = [1, 128], strides = [1, 1]} : vector<1x512xf32> to vector<1x128xf32>
    %137 = math.tanh %136 : vector<1x128xf32>
    %138 = arith.mulf %134, %118 : vector<1x128xf32>
    %139 = arith.mulf %133, %137 : vector<1x128xf32>
    %140 = arith.addf %138, %139 : vector<1x128xf32>
    %141 = math.tanh %140 : vector<1x128xf32>
    %142 = arith.mulf %135, %141 : vector<1x128xf32>
    %c6_i32 = arith.constant 6 : i32
    %143 = arith.index_cast %c6_i32 : i32 to index
    %c0_38 = arith.constant 0 : index
    %144 = vector.load %arg7[%143, %c0_38] : memref<8x512xf32, #tpu.memory_space<vmem>>, vector<1x512xf32>
    %145 = arith.truncf %142 : vector<1x128xf32> to vector<1x128xbf16>
    %c0_39 = arith.constant 0 : index
    %c0_40 = arith.constant 0 : index
    %146 = vector.load %arg2[%c0_39, %c0_40] : memref<128x512xbf16, #tpu.memory_space<vmem>>, vector<128x512xbf16>
    %cst_41 = arith.constant dense<0.000000e+00> : vector<1x512xf32>
    %147 = tpu.matmul %145, %146, %cst_41 {dimension_numbers = #tpu.dot_dimension_numbers<[1], [0], [0], [1], [0, 0, 1, 1], [], []>} : vector<1x128xbf16>, vector<128x512xbf16>, vector<1x512xf32> -> vector<1x512xf32>
    %148 = arith.addf %144, %147 : vector<1x512xf32>
    %149 = vector.extract_strided_slice %148 {offsets = [0, 0], sizes = [1, 384], strides = [1, 1]} : vector<1x512xf32> to vector<1x384xf32>
    %150 = arith.negf %149 : vector<1x384xf32>
    %151 = math.exp %150 : vector<1x384xf32>
    %cst_42 = arith.constant 1.000000e+00 : f32
    %152 = vector.broadcast %cst_42 : f32 to vector<1x384xf32>
    %153 = arith.addf %152, %151 : vector<1x384xf32>
    %154 = arith.divf %152, %153 : vector<1x384xf32>
    %155 = vector.extract_strided_slice %154 {offsets = [0, 0], sizes = [1, 128], strides = [1, 1]} : vector<1x384xf32> to vector<1x128xf32>
    %156 = vector.extract_strided_slice %154 {offsets = [0, 128], sizes = [1, 128], strides = [1, 1]} : vector<1x384xf32> to vector<1x128xf32>
    %157 = vector.extract_strided_slice %154 {offsets = [0, 256], sizes = [1, 128], strides = [1, 1]} : vector<1x384xf32> to vector<1x128xf32>
    %158 = vector.extract_strided_slice %148 {offsets = [0, 384], sizes = [1, 128], strides = [1, 1]} : vector<1x512xf32> to vector<1x128xf32>
    %159 = math.tanh %158 : vector<1x128xf32>
    %160 = arith.mulf %156, %140 : vector<1x128xf32>
    %161 = arith.mulf %155, %159 : vector<1x128xf32>
    %162 = arith.addf %160, %161 : vector<1x128xf32>
    %163 = math.tanh %162 : vector<1x128xf32>
    %164 = arith.mulf %157, %163 : vector<1x128xf32>
    %c7_i32 = arith.constant 7 : i32
    %165 = arith.index_cast %c7_i32 : i32 to index
    %c0_43 = arith.constant 0 : index
    %166 = vector.load %arg7[%165, %c0_43] : memref<8x512xf32, #tpu.memory_space<vmem>>, vector<1x512xf32>
    %167 = arith.truncf %164 : vector<1x128xf32> to vector<1x128xbf16>
    %c0_44 = arith.constant 0 : index
    %c0_45 = arith.constant 0 : index
    %168 = vector.load %arg2[%c0_44, %c0_45] : memref<128x512xbf16, #tpu.memory_space<vmem>>, vector<128x512xbf16>
    %cst_46 = arith.constant dense<0.000000e+00> : vector<1x512xf32>
    %169 = tpu.matmul %167, %168, %cst_46 {dimension_numbers = #tpu.dot_dimension_numbers<[1], [0], [0], [1], [0, 0, 1, 1], [], []>} : vector<1x128xbf16>, vector<128x512xbf16>, vector<1x512xf32> -> vector<1x512xf32>
    %170 = arith.addf %166, %169 : vector<1x512xf32>
    %171 = vector.extract_strided_slice %170 {offsets = [0, 0], sizes = [1, 384], strides = [1, 1]} : vector<1x512xf32> to vector<1x384xf32>
    %172 = arith.negf %171 : vector<1x384xf32>
    %173 = math.exp %172 : vector<1x384xf32>
    %cst_47 = arith.constant 1.000000e+00 : f32
    %174 = vector.broadcast %cst_47 : f32 to vector<1x384xf32>
    %175 = arith.addf %174, %173 : vector<1x384xf32>
    %176 = arith.divf %174, %175 : vector<1x384xf32>
    %177 = vector.extract_strided_slice %176 {offsets = [0, 0], sizes = [1, 128], strides = [1, 1]} : vector<1x384xf32> to vector<1x128xf32>
    %178 = vector.extract_strided_slice %176 {offsets = [0, 128], sizes = [1, 128], strides = [1, 1]} : vector<1x384xf32> to vector<1x128xf32>
    %179 = vector.extract_strided_slice %176 {offsets = [0, 256], sizes = [1, 128], strides = [1, 1]} : vector<1x384xf32> to vector<1x128xf32>
    %180 = vector.extract_strided_slice %170 {offsets = [0, 384], sizes = [1, 128], strides = [1, 1]} : vector<1x512xf32> to vector<1x128xf32>
    %181 = math.tanh %180 : vector<1x128xf32>
    %182 = arith.mulf %178, %162 : vector<1x128xf32>
    %183 = arith.mulf %177, %181 : vector<1x128xf32>
    %184 = arith.addf %182, %183 : vector<1x128xf32>
    %185 = math.tanh %184 : vector<1x128xf32>
    %186 = arith.mulf %179, %185 : vector<1x128xf32>
    %c8_i32 = arith.constant 8 : i32
    %c0_48 = arith.constant 0 : index
    %c0_49 = arith.constant 0 : index
    %187 = vector.load %arg4[%c0_48, %c0_49] : memref<1x128xf32, #tpu.memory_space<vmem>>, vector<1x128xf32>
    %188 = arith.mulf %186, %187 : vector<1x128xf32>
    %cst_50 = arith.constant dense<0.000000e+00> : vector<1xf32>
    %189 = vector.multi_reduction <add>, %188, %cst_50 [1] : vector<1x128xf32> to vector<1xf32>
    %190 = vector.shape_cast %189 : vector<1xf32> to vector<1x1xf32>
    %c0_51 = arith.constant 0 : index
    %c0_52 = arith.constant 0 : index
    %191 = vector.load %arg5[%c0_51, %c0_52] : memref<1x1xf32, #tpu.memory_space<vmem>>, vector<1x1xf32>
    %192 = arith.addf %190, %191 : vector<1x1xf32>
    %c0_53 = arith.constant 0 : index
    %c0_54 = arith.constant 0 : index
    %193 = vector.load %arg6[%c0_53, %c0_54] : memref<1x1xf32, #tpu.memory_space<vmem>>, vector<1x1xf32>
    tpu.vector_store %arg6[%c0_53, %c0_54], %192 {strides = array<i32>} : memref<1x1xf32, #tpu.memory_space<vmem>>, vector<1x1xf32>,
    return
  }
}

</mosaic_0001>

<bundles_post_ra>
// kernel: lstm_forward_prepped.1
= control target key start
LH: loop header
LB: loop body
LE: loop exit
PB: predicated region body
PF: predicated region fallthrough
CT: control target
= control target key end

     0   :  { %s2074_s0 = inlined_call_operand.vmem [shape: f32[8,1], index: 0, kind: input, shape index: {}]   ;;  %s2075_s1 = inlined_call_operand.vmem [shape: f32[1,512], index: 1, kind: input, shape index: {}]   ;;  %s2076_s2 = inlined_call_operand.hbm [shape: bf16[128,512], index: 2, kind: input, shape index: {}]   ;;  %s2077_s3 = inlined_call_operand.vmem [shape: f32[1,512], index: 3, kind: input, shape index: {}]   ;;  %s2078_s4 = inlined_call_operand.vmem [shape: f32[1,128], index: 4, kind: input, shape index: {}]   ;;  %s2079_s5 = inlined_call_operand.<no memory space> [shape: f32[1,1], index: 5, kind: input, shape index: {}]   ;;  %s2080_s6 = inlined_call_operand.hbm [shape: f32[1,1], index: 6, kind: output, shape index: {}]  }
   0x1   :  { %v11_v0 = vstv %s2079_s5 }
   0x2   :  { %12 = vst [vmem:[#allocation3] sm:$0x1] %v11_v0 }
   0x3   :  { %13 = vsyncpa [#allocation5], 0 }
   0x4   :  { %14 = vsyncpa [#allocation6], 0  ;;  %s1626_s23 = smov [#allocation4]   ;;  %s1578_s27 = scalar_lea.hbm %s2076_s2, 4096 }
   0x5   :  { %s24_s24 = sshll.u32 %s1626_s23, 4  ;;  %p1579_p0 = scmp.ne.s32.totalorder %s2076_s2, %s1578_s27  ;;  %s25_s24 = int_to_ptr.vmem [resolvable:$true] %s24_s24 }
   0x6   :  { %p1582_p1 = scmp.lt.u32.totalorder %s1578_s27, %s2076_s2 }
   0x8   :  { %p1584_p2 = pnand %p1582_p1, %p1579_p0 }
   0xa   :  { %1587 = shalt.err (!%p1584_p2)
}
   0xb   :  { %s1588_s5 = scalar_lea.vmem %s25_s24, 4096  ;;  %p1593_p4 = scmp.lt.s32.totalorder %s25_s24, %s25_s24 }
   0xc   :  { %p1589_p3 = scmp.ne.s32.totalorder %s25_s24, %s1588_s5  ;;  %p1594_p5 = scmp.lt.s32.totalorder %s1588_s5, %s1588_s5 }
   0xe   :  { %p1595_p6 = por %p1594_p5, %p1593_p4 }
  0x10   :  { %p1596_p7 = pnand %p1595_p6, %p1589_p3 }
  0x12   :  { %1599 = shalt.err (!%p1596_p7)
}
  0x13   :  { %s1627_s8 = smov 256   ;;  %s1628_s9 = smov 16  }
  0x14   :  { %30 = dma.hbm_to_vmem [thread:$0]  %s2076_s2, 4096, %s25_s24, [#allocation5], %s1627_s8, %s1627_s8, %s1628_s9  }
  0x15   :  { %1622 = dma.done.wait [#allocation5], 4096  }
  0x16   :  { %1623 = vsyncadd [#allocation5], 4294963200  ;;  %v1629_v1 = vmov 0   ;;  %v1685_v2 = vld [vmem:[#allocation4 + $0x4] ss:$16 sps:$4 sm:$0xff]   ;;  %v49_v35 = vlaneseq  ;;  %vm1375_vm0 = vcmask 1040384  }
  0x17   :  { %328 = vmatprep.mubr.bf16.mxu0 %v1629_v1  ;;  %369 = vmatprep.mubr.bf16.mxu1 %v1629_v1  ;;  %v1687_v3 = vld [vmem:[#allocation4 + $0xc] ss:$16 sps:$4 sm:$0xff]   ;;  %v1690_v4 = vld [vmem:[#allocation4] ss:$16 sps:$4 sm:$0xff]   ;;  %v1692_v5 = vld [vmem:[#allocation4 + $0x8] ss:$16 sps:$4 sm:$0xff]  }
  0x18   :  { %1444 = vset.pattern.permute.xlu0 %v1629_v1  ;;  %296 = vmatprep.subr.bf16.mxu0 %v1685_v2  ;;  %v1695_v6 = vld [vmem:[#allocation4 + $0x24] ss:$16 sps:$4 sm:$0xff]   ;;  %v1699_v7 = vld [vmem:[#allocation4 + $0x2c] ss:$16 sps:$4 sm:$0xff]   ;;  %v1701_v8 = vld [vmem:[#allocation4 + $0x20] ss:$16 sps:$4 sm:$0xff]  }
  0x19   :  { %337 = vmatprep.subr.bf16.mxu1 %v1687_v3  ;;  %297 = vmatpush1.bf16.msra.mxu0 %v1690_v4  ;;  %v1704_v9 = vld [vmem:[#allocation4 + $0x28] ss:$16 sps:$4 sm:$0xff]   ;;  %v1707_v10 = vld [vmem:[#allocation4 + $0x44] ss:$16 sps:$4 sm:$0xff]   ;;  %v1709_v11 = vld [vmem:[#allocation4 + $0x4c] ss:$16 sps:$4 sm:$0xff]  }
  0x1a   :  { %338 = vmatpush1.bf16.msra.mxu1 %v1692_v5  ;;  %298 = vmatprep.subr.bf16.mxu0 %v1695_v6  ;;  %v1711_v12 = vld [vmem:[#allocation4 + $0x40] ss:$16 sps:$4 sm:$0xff]   ;;  %v1713_v13 = vld [vmem:[#allocation4 + $0x48] ss:$16 sps:$4 sm:$0xff]   ;;  %v1717_v14 = vld [vmem:[#allocation4 + $0x64] ss:$16 sps:$4 sm:$0xff]  }
  0x1b   :  { %339 = vmatprep.subr.bf16.mxu1 %v1699_v7  ;;  %v1721_v15 = vld [vmem:[#allocation4 + $0x6c] ss:$16 sps:$4 sm:$0xff]   ;;  %v1723_v16 = vld [vmem:[#allocation4 + $0x60] ss:$16 sps:$4 sm:$0xff]   ;;  %v1727_v17 = vld [vmem:[#allocation4 + $0x68] ss:$16 sps:$4 sm:$0xff]  }
  0x1c   :  { %v1729_v18 = vld [vmem:[#allocation4 + $0x84] ss:$16 sps:$4 sm:$0xff]   ;;  %v1733_v19 = vld [vmem:[#allocation4 + $0x8c] ss:$16 sps:$4 sm:$0xff]   ;;  %v1735_v20 = vld [vmem:[#allocation4 + $0x80] ss:$16 sps:$4 sm:$0xff]  }
  0x1d   :  { %299 = vmatpush1.bf16.msra.mxu0 %v1701_v8  ;;  %v1737_v21 = vld [vmem:[#allocation4 + $0x88] ss:$16 sps:$4 sm:$0xff]   ;;  %v1741_v22 = vld [vmem:[#allocation4 + $0xa4] ss:$16 sps:$4 sm:$0xff]   ;;  %v1745_v23 = vld [vmem:[#allocation4 + $0xac] ss:$16 sps:$4 sm:$0xff]  }
  0x1e   :  { %340 = vmatpush1.bf16.msra.mxu1 %v1704_v9  ;;  %300 = vmatprep.subr.bf16.mxu0 %v1707_v10  ;;  %v1749_v24 = vld [vmem:[#allocation4 + $0xa0] ss:$16 sps:$4 sm:$0xff]   ;;  %v1751_v25 = vld [vmem:[#allocation4 + $0xa8] ss:$16 sps:$4 sm:$0xff]   ;;  %v1755_v26 = vld [vmem:[#allocation4 + $0xc4] ss:$16 sps:$4 sm:$0xff]  }
  0x1f   :  { %341 = vmatprep.subr.bf16.mxu1 %v1709_v11  ;;  %v1757_v27 = vld [vmem:[#allocation4 + $0xcc] ss:$16 sps:$4 sm:$0xff]   ;;  %v1764_v29 = vld [vmem:[#allocation4 + $0xc0] ss:$16 sps:$4 sm:$0xff]   ;;  %v1766_v30 = vld [vmem:[#allocation4 + $0xc8] ss:$16 sps:$4 sm:$0xff]  }
  0x20   :  { %v41_v28 = vld [vmem:[%s2074_s0] sm:$0xff]  ;;  %v1778_v34 = vld [vmem:[#allocation4 + $0xe8] ss:$16 sps:$4 sm:$0xff]   ;;  %v50_v36 = vshrl.u32 %v49_v35, 7  ;;  %v1630_v60 = vmov 1966171168  }
  0x21   :  { %301 = vmatpush1.bf16.msra.mxu0 %v1711_v12  ;;  %45 = vperm.xlu0 %1444, %v41_v28   ;;  %v1770_v31 = vld [vmem:[#allocation4 + $0xe4] ss:$16 sps:$4 sm:$0xff]   ;;  %v1772_v32 = vld [vmem:[#allocation4 + $0xec] ss:$16 sps:$4 sm:$0xff]   ;;  %v1776_v33 = vld [vmem:[#allocation4 + $0xe0] ss:$16 sps:$4 sm:$0xff]   ;;  %v385_v61 = vunpack.c.l.s4 %v1630_v60 }
  0x22   :  { %342 = vmatpush1.bf16.msra.mxu1 %v1713_v13  ;;  %302 = vmatprep.subr.bf16.mxu0 %v1717_v14  ;;  %v51_v37 = vsub.s32 0, %v50_v36  ;;  %v55_v38 = vsub.s32 1, %v50_v36  ;;  %v59_v39 = vsub.s32 2, %v50_v36  ;;  %v63_v40 = vsub.s32 3, %v50_v36  ;;  %v42_v41 = vld [vmem:[%s2075_s1] sm:$0xf] }
  0x23   :  { %343 = vmatprep.subr.bf16.mxu1 %v1721_v15  ;;  %v73_v42 = vld [vmem:[%s2077_s3] sm:$0xf]  ;;  %v386_v62 = vunpack.c.0.s8 %v385_v61  ;;  %s1631_s16 = smov [#allocation7]   ;;  %vm1381_vm1 = vcmask 0  }
  0x24   :  { %v52_v43 = vrot.slane %v42_v41, %v51_v37  ;;  %v56_v44 = vrot.slane %v42_v41, %v55_v38  ;;  %v60_v45 = vrot.slane %v42_v41, %v59_v39  ;;  %v64_v46 = vrot.slane %v42_v41, %v63_v40  ;;  %s1389_s17 = sshll.u32 %s1631_s16, 4  ;;  %s1390_s17 = int_to_ptr.vmem [resolvable:$true] %s1389_s17 }
  0x25   :  { %303 = vmatpush1.bf16.msra.mxu0 %v1723_v16  ;;  %v78_v47 = vrot.slane %v73_v42, %v51_v37  ;;  %v82_v48 = vrot.slane %v73_v42, %v55_v38  ;;  %v86_v49 = vrot.slane %v73_v42, %v59_v39  ;;  %v90_v50 = vrot.slane %v73_v42, %v63_v40  ;;  %s1600_s18 = scalar_lea.vmem %s1390_s17, 16  ;;  %s1604_s19 = scalar_lea.vmem %s1390_s17, 32 }
  0x26   :  { %344 = vmatpush1.bf16.msra.mxu1 %v1727_v17  ;;  %304 = vmatprep.subr.bf16.mxu0 %v1729_v18  ;;  %v1828_v63 = vsub.s32 %v386_v62, %v50_v36  ;;  %p1601_p8 = scmp.ne.s32.totalorder %s1390_s17, %s1600_s18  ;;  %p1605_p9 = scmp.lt.s32.totalorder %s1390_s17, %s1390_s17 }
  0x27   :  { %345 = vmatprep.subr.bf16.mxu1 %v1733_v19  ;;  %p1606_p10 = scmp.lt.s32.totalorder %s1604_s19, %s1600_s18 }
  0x29   :  { %305 = vmatpush1.bf16.msra.mxu0 %v1735_v20  ;;  %p1607_p11 = por %p1606_p10, %p1605_p9 }
  0x2a   :  { %346 = vmatpush1.bf16.msra.mxu1 %v1737_v21  ;;  %306 = vmatprep.subr.bf16.mxu0 %v1741_v22 }
  0x2b   :  { %347 = vmatprep.subr.bf16.mxu1 %v1745_v23  ;;  %p1608_p12 = pnand %p1607_p11, %p1601_p8 }
  0x2d   :  { %307 = vmatpush1.bf16.msra.mxu0 %v1749_v24 }
  0x2e   :  { %348 = vmatpush1.bf16.msra.mxu1 %v1751_v25  ;;  %308 = vmatprep.subr.bf16.mxu0 %v1755_v26 }
  0x2f   :  { %349 = vmatprep.subr.bf16.mxu1 %v1757_v27 }
  0x31   :  { %309 = vmatpush1.bf16.msra.mxu0 %v1764_v29 }
  0x32   :  { %350 = vmatpush1.bf16.msra.mxu1 %v1766_v30  ;;  %310 = vmatprep.subr.bf16.mxu0 %v1770_v31 }
  0x33   :  { %351 = vmatprep.subr.bf16.mxu1 %v1772_v32 }
  0x35   :  { %311 = vmatpush1.bf16.msra.mxu0 %v1776_v33 }
  0x36   :  { %352 = vmatpush1.bf16.msra.mxu1 %v1778_v34  ;;  %431 = vmatprep.subr.bf16.mxu0 %v1685_v2 }
  0x37   :  { %472 = vmatprep.subr.bf16.mxu1 %v1687_v3 }
  0x38   :  { %329 = vmatmul.mubr.bf16.vlgmr.msra.gmra.mrb[0].mxu0 %v1629_v1 }
  0x39   :  { %370 = vmatmul.mubr.bf16.vlgmr.msra.gmra.mrb[0].mxu1 %v1629_v1  ;;  %432 = vmatpush1.bf16.msra.mxu0 %v1690_v4 }
  0x3a   :  { %473 = vmatpush1.bf16.msra.mxu1 %v1692_v5  ;;  %433 = vmatprep.subr.bf16.mxu0 %v1695_v6 }
  0x3b   :  { %474 = vmatprep.subr.bf16.mxu1 %v1699_v7  ;;  %463 = vmatprep.mubr.bf16.mxu0 %v1629_v1 }
  0x3c   :  { %504 = vmatprep.mubr.bf16.mxu1 %v1629_v1 }
  0x3d   :  { %434 = vmatpush1.bf16.msra.mxu0 %v1701_v8 }
  0x3e   :  { %475 = vmatpush1.bf16.msra.mxu1 %v1704_v9  ;;  %435 = vmatprep.subr.bf16.mxu0 %v1707_v10 }
  0x3f   :  { %476 = vmatprep.subr.bf16.mxu1 %v1709_v11 }
  0x41   :  { %436 = vmatpush1.bf16.msra.mxu0 %v1711_v12 }
  0x42   :  { %477 = vmatpush1.bf16.msra.mxu1 %v1713_v13  ;;  %437 = vmatprep.subr.bf16.mxu0 %v1717_v14 }
  0x43   :  { %478 = vmatprep.subr.bf16.mxu1 %v1721_v15 }
  0x45   :  { %438 = vmatpush1.bf16.msra.mxu0 %v1723_v16 }
  0x46   :  { %479 = vmatpush1.bf16.msra.mxu1 %v1727_v17  ;;  %439 = vmatprep.subr.bf16.mxu0 %v1729_v18 }
  0x47   :  { %480 = vmatprep.subr.bf16.mxu1 %v1733_v19 }
  0x49   :  { %440 = vmatpush1.bf16.msra.mxu0 %v1735_v20 }
  0x4a   :  { %481 = vmatpush1.bf16.msra.mxu1 %v1737_v21  ;;  %441 = vmatprep.subr.bf16.mxu0 %v1741_v22 }
  0x4b   :  { %482 = vmatprep.subr.bf16.mxu1 %v1745_v23 }
  0x4d   :  { %442 = vmatpush1.bf16.msra.mxu0 %v1749_v24 }
  0x4e   :  { %483 = vmatpush1.bf16.msra.mxu1 %v1751_v25  ;;  %443 = vmatprep.subr.bf16.mxu0 %v1755_v26 }
  0x4f   :  { %484 = vmatprep.subr.bf16.mxu1 %v1757_v27 }
  0x51   :  { %444 = vmatpush1.bf16.msra.mxu0 %v1764_v29 }
  0x52   :  { %485 = vmatpush1.bf16.msra.mxu1 %v1766_v30  ;;  %445 = vmatprep.subr.bf16.mxu0 %v1770_v31 }
  0x53   :  { %486 = vmatprep.subr.bf16.mxu1 %v1772_v32 }
  0x55   :  { %446 = vmatpush1.bf16.msra.mxu0 %v1776_v33 }
  0x56   :  { %487 = vmatpush1.bf16.msra.mxu1 %v1778_v34  ;;  %566 = vmatprep.subr.bf16.mxu0 %v1685_v2 }
  0x57   :  { %607 = vmatprep.subr.bf16.mxu1 %v1687_v3 }
  0xa0   :  { %v46_v51 = vpop.permute.xlu0 %45 }
  0xa1   :  { %v69_v52 = vmul.f32 %v52_v43, %v46_v51  ;;  %v70_v53 = vmul.f32 %v56_v44, %v46_v51  ;;  %v71_v54 = vmul.f32 %v60_v45, %v46_v51  ;;  %v72_v55 = vmul.f32 %v64_v46, %v46_v51 }
  0xa3   :  { %v95_v56 = vadd.f32 %v78_v47, %v69_v52  ;;  %v96_v57 = vadd.f32 %v82_v48, %v70_v53  ;;  %v97_v58 = vadd.f32 %v86_v49, %v71_v54  ;;  %v98_v59 = vadd.f32 %v90_v50, %v72_v55 }
  0xa5   :  { %99 = vst [vmem:[#allocation2] sm:$0xff] %v95_v56  ;;  %100 = vst [vmem:[#allocation2 + $0x8] sm:$0xff] %v96_v57 }
  0xa6   :  { %101 = vst [vmem:[#allocation2 + $0x10] sm:$0xff] %v97_v58  ;;  %102 = vst [vmem:[#allocation2 + $0x18] sm:$0xff] %v98_v59 }
  0xad   :  { %v103_v47 = vld [vmem:[#allocation2] ss:$8 sm:$0xf] }
 0x10b   :  { %v330_v0 = vpop.f32.mrb[0].mxu0 }
 0x10c   :  { %v371_v28 = vpop.f32.mrb[0].mxu1  ;;  %v332_v35 = vpop.f32.mrb[1].mxu0 }
 0x10d   :  { %v373_v37 = vpop.f32.mrb[1].mxu1  ;;  %v382_v38 = vcombine.low %v330_v0, %v332_v35  ;;  %v334_v40 = vpop.f32.mrb[2].mxu0 }
 0x10e   :  { %v383_v39 = vcombine.low %v371_v28, %v373_v37  ;;  %v375_v41 = vpop.f32.mrb[2].mxu1  ;;  %v335_v42 = vpop.f32.mrb[3].mxu0 }
 0x10f   :  { %v376_v43 = vpop.f32.mrb[3].mxu1  ;;  %v390_v44 = vrot.slane %v382_v38, %v1828_v63 }
 0x110   :  { %v397_v45 = vrot.slane %v383_v39, %v1828_v63 }
 0x112   :  { %v398_v46 = vcombine.low %v390_v44, %v397_v45 }
 0x114   :  { %v405_v48 = vrot.slane %v398_v46, %v1828_v63 }
 0x116   :  { %v407_v36 = vadd.f32 %v405_v48, %v103_v47  ;;  %v429_v48 = vld [vmem:[#allocation2 + $0x1] ss:$8 sm:$0xf] }
 0x118   :  { %v1430_v49 = vmul.f32 -1.442695, %v407_v36  ;;  %v415_v52 = vrot.slane %v407_v36, 3 }
 0x11a   :  { %1493 = vpow2.f32 %v1430_v49 }
 0x124   :  { %v1494_v50 = vpop.eup %1493 }
 0x125   :  { %v411_v51 = vadd.f32 1.0, %v1494_v50 }
 0x127   :  { %1495 = vrcp.f32 %v411_v51 }
 0x128   :  { %1497 = vtanh.f32 %v415_v52 }
 0x131   :  { %v1496_v53 = vpop.eup %1495 }
 0x132   :  { %v419_v54 = vrot.slane %v1496_v53, 1  ;;  %v1498_v55 = vpop.eup %1497  ;;  %v425_v59 = vrot.slane %v1496_v53, 2 }
 0x133   :  { %v422_v56 = vmul.f32 %v1498_v55, %v1496_v53 }
 0x134   :  { %v421_v57 = vmul.f32 0.0, %v419_v54 }
 0x136   :  { %v1833_v58 = vadd.f32 %v422_v56, %v421_v57 }
 0x138   :  { %1499 = vtanh.f32 %v1833_v58 }
 0x142   :  { %v1500_v60 = vpop.eup %1499 }
 0x143   :  { %v427_v61 = vmul.f32 %v1500_v60, %v425_v59 }
 0x145   :  { %v430_v62 = vpack.c.bf16 %v427_v61, %v427_v61 }
 0x147   :  { %464 = vmatmul.mubr.bf16.vlgmr.msra.gmra.mrb[4].mxu0 %v430_v62  ;;  %505 = vmatmul.mubr.bf16.vlgmr.msra.gmra.mrb[4].mxu1 %v430_v62 }
 0x148   :  { %567 = vmatpush1.bf16.msra.mxu0 %v1690_v4  ;;  %608 = vmatpush1.bf16.msra.mxu1 %v1692_v5 }
 0x149   :  { %568 = vmatprep.subr.bf16.mxu0 %v1695_v6  ;;  %609 = vmatprep.subr.bf16.mxu1 %v1699_v7 }
 0x14a   :  { %598 = vmatprep.mubr.bf16.mxu0 %v1629_v1  ;;  %639 = vmatprep.mubr.bf16.mxu1 %v1629_v1 }
 0x14c   :  { %569 = vmatpush1.bf16.msra.mxu0 %v1701_v8  ;;  %610 = vmatpush1.bf16.msra.mxu1 %v1704_v9 }
 0x14d   :  { %570 = vmatprep.subr.bf16.mxu0 %v1707_v10  ;;  %611 = vmatprep.subr.bf16.mxu1 %v1709_v11 }
 0x150   :  { %571 = vmatpush1.bf16.msra.mxu0 %v1711_v12  ;;  %612 = vmatpush1.bf16.msra.mxu1 %v1713_v13 }
 0x151   :  { %572 = vmatprep.subr.bf16.mxu0 %v1717_v14  ;;  %613 = vmatprep.subr.bf16.mxu1 %v1721_v15 }
 0x154   :  { %573 = vmatpush1.bf16.msra.mxu0 %v1723_v16  ;;  %614 = vmatpush1.bf16.msra.mxu1 %v1727_v17 }
 0x155   :  { %574 = vmatprep.subr.bf16.mxu0 %v1729_v18  ;;  %615 = vmatprep.subr.bf16.mxu1 %v1733_v19 }
 0x158   :  { %575 = vmatpush1.bf16.msra.mxu0 %v1735_v20  ;;  %616 = vmatpush1.bf16.msra.mxu1 %v1737_v21 }
 0x159   :  { %576 = vmatprep.subr.bf16.mxu0 %v1741_v22  ;;  %617 = vmatprep.subr.bf16.mxu1 %v1745_v23 }
 0x15c   :  { %577 = vmatpush1.bf16.msra.mxu0 %v1749_v24  ;;  %618 = vmatpush1.bf16.msra.mxu1 %v1751_v25 }
 0x15d   :  { %578 = vmatprep.subr.bf16.mxu0 %v1755_v26  ;;  %619 = vmatprep.subr.bf16.mxu1 %v1757_v27 }
 0x160   :  { %579 = vmatpush1.bf16.msra.mxu0 %v1764_v29  ;;  %620 = vmatpush1.bf16.msra.mxu1 %v1766_v30 }
 0x161   :  { %580 = vmatprep.subr.bf16.mxu0 %v1770_v31  ;;  %621 = vmatprep.subr.bf16.mxu1 %v1772_v32 }
 0x164   :  { %581 = vmatpush1.bf16.msra.mxu0 %v1776_v33  ;;  %622 = vmatpush1.bf16.msra.mxu1 %v1778_v34 }
 0x165   :  { %701 = vmatprep.subr.bf16.mxu0 %v1685_v2  ;;  %742 = vmatprep.subr.bf16.mxu1 %v1687_v3 }
 0x21a   :  { %v465_v0 = vpop.f32.mrb[4].mxu0  ;;  %v506_v28 = vpop.f32.mrb[4].mxu1 }
 0x21b   :  { %v467_v35 = vpop.f32.mrb[5].mxu0  ;;  %v508_v37 = vpop.f32.mrb[5].mxu1 }
 0x21c   :  { %v517_v38 = vcombine.low %v465_v0, %v467_v35  ;;  %v518_v39 = vcombine.low %v506_v28, %v508_v37  ;;  %v469_v40 = vpop.f32.mrb[6].mxu0  ;;  %v510_v41 = vpop.f32.mrb[6].mxu1 }
 0x21d   :  { %v470_v42 = vpop.f32.mrb[7].mxu0  ;;  %v511_v43 = vpop.f32.mrb[7].mxu1 }
 0x21e   :  { %v525_v44 = vrot.slane %v517_v38, %v1828_v63  ;;  %v532_v45 = vrot.slane %v518_v39, %v1828_v63 }
 0x220   :  { %v533_v46 = vcombine.low %v525_v44, %v532_v45 }
 0x222   :  { %v540_v47 = vrot.slane %v533_v46, %v1828_v63 }
 0x224   :  { %v542_v36 = vadd.f32 %v540_v47, %v429_v48  ;;  %v564_v48 = vld [vmem:[#allocation2 + $0x2] ss:$8 sm:$0xf] }
 0x226   :  { %v1431_v49 = vmul.f32 -1.442695, %v542_v36  ;;  %v550_v52 = vrot.slane %v542_v36, 3 }
 0x228   :  { %1501 = vpow2.f32 %v1431_v49 }
 0x232   :  { %v1502_v50 = vpop.eup %1501 }
 0x233   :  { %v546_v51 = vadd.f32 1.0, %v1502_v50 }
 0x235   :  { %1503 = vrcp.f32 %v546_v51 }
 0x236   :  { %1505 = vtanh.f32 %v550_v52 }
 0x23f   :  { %v1504_v53 = vpop.eup %1503 }
 0x240   :  { %v554_v54 = vrot.slane %v1504_v53, 1  ;;  %v1506_v55 = vpop.eup %1505  ;;  %v560_v60 = vrot.slane %v1504_v53, 2 }
 0x241   :  { %v557_v56 = vmul.f32 %v1506_v55, %v1504_v53 }
 0x242   :  { %v556_v57 = vmul.f32 %v554_v54, %v1833_v58 }
 0x244   :  { %v1874_v59 = vadd.f32 %v557_v56, %v556_v57 }
 0x246   :  { %1507 = vtanh.f32 %v1874_v59 }
 0x250   :  { %v1508_v61 = vpop.eup %1507 }
 0x251   :  { %v562_v62 = vmul.f32 %v1508_v61, %v560_v60 }
 0x253   :  { %v565_v0 = vpack.c.bf16 %v562_v62, %v562_v62 }
 0x255   :  { %599 = vmatmul.mubr.bf16.vlgmr.msra.gmra.mrb[8].mxu0 %v565_v0  ;;  %640 = vmatmul.mubr.bf16.vlgmr.msra.gmra.mrb[8].mxu1 %v565_v0 }
 0x256   :  { %702 = vmatpush1.bf16.msra.mxu0 %v1690_v4  ;;  %743 = vmatpush1.bf16.msra.mxu1 %v1692_v5 }
 0x257   :  { %703 = vmatprep.subr.bf16.mxu0 %v1695_v6  ;;  %744 = vmatprep.subr.bf16.mxu1 %v1699_v7 }
 0x258   :  { %733 = vmatprep.mubr.bf16.mxu0 %v1629_v1  ;;  %774 = vmatprep.mubr.bf16.mxu1 %v1629_v1 }
 0x25a   :  { %704 = vmatpush1.bf16.msra.mxu0 %v1701_v8  ;;  %745 = vmatpush1.bf16.msra.mxu1 %v1704_v9 }
 0x25b   :  { %705 = vmatprep.subr.bf16.mxu0 %v1707_v10  ;;  %746 = vmatprep.subr.bf16.mxu1 %v1709_v11 }
 0x25e   :  { %706 = vmatpush1.bf16.msra.mxu0 %v1711_v12  ;;  %747 = vmatpush1.bf16.msra.mxu1 %v1713_v13 }
 0x25f   :  { %707 = vmatprep.subr.bf16.mxu0 %v1717_v14  ;;  %748 = vmatprep.subr.bf16.mxu1 %v1721_v15 }
 0x262   :  { %708 = vmatpush1.bf16.msra.mxu0 %v1723_v16  ;;  %749 = vmatpush1.bf16.msra.mxu1 %v1727_v17 }
 0x263   :  { %709 = vmatprep.subr.bf16.mxu0 %v1729_v18  ;;  %750 = vmatprep.subr.bf16.mxu1 %v1733_v19 }
 0x266   :  { %710 = vmatpush1.bf16.msra.mxu0 %v1735_v20  ;;  %751 = vmatpush1.bf16.msra.mxu1 %v1737_v21 }
 0x267   :  { %711 = vmatprep.subr.bf16.mxu0 %v1741_v22  ;;  %752 = vmatprep.subr.bf16.mxu1 %v1745_v23 }
 0x26a   :  { %712 = vmatpush1.bf16.msra.mxu0 %v1749_v24  ;;  %753 = vmatpush1.bf16.msra.mxu1 %v1751_v25 }
 0x26b   :  { %713 = vmatprep.subr.bf16.mxu0 %v1755_v26  ;;  %754 = vmatprep.subr.bf16.mxu1 %v1757_v27 }
 0x26e   :  { %714 = vmatpush1.bf16.msra.mxu0 %v1764_v29  ;;  %755 = vmatpush1.bf16.msra.mxu1 %v1766_v30 }
 0x26f   :  { %715 = vmatprep.subr.bf16.mxu0 %v1770_v31  ;;  %756 = vmatprep.subr.bf16.mxu1 %v1772_v32 }
 0x272   :  { %716 = vmatpush1.bf16.msra.mxu0 %v1776_v33  ;;  %757 = vmatpush1.bf16.msra.mxu1 %v1778_v34 }
 0x273   :  { %836 = vmatprep.subr.bf16.mxu0 %v1685_v2  ;;  %877 = vmatprep.subr.bf16.mxu1 %v1687_v3 }
 0x328   :  { %v600_v58 = vpop.f32.mrb[8].mxu0  ;;  %v641_v28 = vpop.f32.mrb[8].mxu1 }
 0x329   :  { %v602_v35 = vpop.f32.mrb[9].mxu0  ;;  %v643_v37 = vpop.f32.mrb[9].mxu1 }
 0x32a   :  { %v652_v38 = vcombine.low %v600_v58, %v602_v35  ;;  %v653_v39 = vcombine.low %v641_v28, %v643_v37  ;;  %v604_v40 = vpop.f32.mrb[10].mxu0  ;;  %v645_v41 = vpop.f32.mrb[10].mxu1 }
 0x32b   :  { %v605_v42 = vpop.f32.mrb[11].mxu0  ;;  %v646_v43 = vpop.f32.mrb[11].mxu1 }
 0x32c   :  { %v660_v44 = vrot.slane %v652_v38, %v1828_v63  ;;  %v667_v45 = vrot.slane %v653_v39, %v1828_v63 }
 0x32e   :  { %v668_v46 = vcombine.low %v660_v44, %v667_v45 }
 0x330   :  { %v675_v47 = vrot.slane %v668_v46, %v1828_v63 }
 0x332   :  { %v677_v36 = vadd.f32 %v675_v47, %v564_v48  ;;  %v699_v48 = vld [vmem:[#allocation2 + $0x3] ss:$8 sm:$0xf] }
 0x334   :  { %v1432_v49 = vmul.f32 -1.442695, %v677_v36  ;;  %v685_v52 = vrot.slane %v677_v36, 3 }
 0x336   :  { %1509 = vpow2.f32 %v1432_v49 }
 0x340   :  { %v1510_v50 = vpop.eup %1509 }
 0x341   :  { %v681_v51 = vadd.f32 1.0, %v1510_v50 }
 0x343   :  { %1511 = vrcp.f32 %v681_v51 }
 0x344   :  { %1513 = vtanh.f32 %v685_v52 }
 0x34d   :  { %v1512_v53 = vpop.eup %1511 }
 0x34e   :  { %v689_v54 = vrot.slane %v1512_v53, 1  ;;  %v1514_v55 = vpop.eup %1513  ;;  %v695_v61 = vrot.slane %v1512_v53, 2 }
 0x34f   :  { %v692_v56 = vmul.f32 %v1514_v55, %v1512_v53 }
 0x350   :  { %v691_v57 = vmul.f32 %v689_v54, %v1874_v59 }
 0x352   :  { %v1915_v60 = vadd.f32 %v692_v56, %v691_v57 }
 0x354   :  { %1515 = vtanh.f32 %v1915_v60 }
 0x35e   :  { %v1516_v62 = vpop.eup %1515 }
 0x35f   :  { %v697_v0 = vmul.f32 %v1516_v62, %v695_v61 }
 0x361   :  { %v700_v58 = vpack.c.bf16 %v697_v0, %v697_v0 }
 0x363   :  { %734 = vmatmul.mubr.bf16.vlgmr.msra.gmra.mrb[12].mxu0 %v700_v58  ;;  %775 = vmatmul.mubr.bf16.vlgmr.msra.gmra.mrb[12].mxu1 %v700_v58 }
 0x364   :  { %837 = vmatpush1.bf16.msra.mxu0 %v1690_v4  ;;  %878 = vmatpush1.bf16.msra.mxu1 %v1692_v5 }
 0x365   :  { %838 = vmatprep.subr.bf16.mxu0 %v1695_v6  ;;  %879 = vmatprep.subr.bf16.mxu1 %v1699_v7 }
 0x366   :  { %868 = vmatprep.mubr.bf16.mxu0 %v1629_v1  ;;  %909 = vmatprep.mubr.bf16.mxu1 %v1629_v1 }
 0x368   :  { %839 = vmatpush1.bf16.msra.mxu0 %v1701_v8  ;;  %880 = vmatpush1.bf16.msra.mxu1 %v1704_v9 }
 0x369   :  { %840 = vmatprep.subr.bf16.mxu0 %v1707_v10  ;;  %881 = vmatprep.subr.bf16.mxu1 %v1709_v11 }
 0x36c   :  { %841 = vmatpush1.bf16.msra.mxu0 %v1711_v12  ;;  %882 = vmatpush1.bf16.msra.mxu1 %v1713_v13 }
 0x36d   :  { %842 = vmatprep.subr.bf16.mxu0 %v1717_v14  ;;  %883 = vmatprep.subr.bf16.mxu1 %v1721_v15 }
 0x370   :  { %843 = vmatpush1.bf16.msra.mxu0 %v1723_v16  ;;  %884 = vmatpush1.bf16.msra.mxu1 %v1727_v17 }
 0x371   :  { %844 = vmatprep.subr.bf16.mxu0 %v1729_v18  ;;  %885 = vmatprep.subr.bf16.mxu1 %v1733_v19 }
 0x374   :  { %845 = vmatpush1.bf16.msra.mxu0 %v1735_v20  ;;  %886 = vmatpush1.bf16.msra.mxu1 %v1737_v21 }
 0x375   :  { %846 = vmatprep.subr.bf16.mxu0 %v1741_v22  ;;  %887 = vmatprep.subr.bf16.mxu1 %v1745_v23 }
 0x378   :  { %847 = vmatpush1.bf16.msra.mxu0 %v1749_v24  ;;  %888 = vmatpush1.bf16.msra.mxu1 %v1751_v25 }
 0x379   :  { %848 = vmatprep.subr.bf16.mxu0 %v1755_v26  ;;  %889 = vmatprep.subr.bf16.mxu1 %v1757_v27 }
 0x37c   :  { %849 = vmatpush1.bf16.msra.mxu0 %v1764_v29  ;;  %890 = vmatpush1.bf16.msra.mxu1 %v1766_v30 }
 0x37d   :  { %850 = vmatprep.subr.bf16.mxu0 %v1770_v31  ;;  %891 = vmatprep.subr.bf16.mxu1 %v1772_v32 }
 0x380   :  { %851 = vmatpush1.bf16.msra.mxu0 %v1776_v33  ;;  %892 = vmatpush1.bf16.msra.mxu1 %v1778_v34 }
 0x381   :  { %971 = vmatprep.subr.bf16.mxu0 %v1685_v2  ;;  %1012 = vmatprep.subr.bf16.mxu1 %v1687_v3 }
 0x436   :  { %v735_v59 = vpop.f32.mrb[12].mxu0  ;;  %v776_v28 = vpop.f32.mrb[12].mxu1 }
 0x437   :  { %v737_v35 = vpop.f32.mrb[13].mxu0  ;;  %v778_v37 = vpop.f32.mrb[13].mxu1 }
 0x438   :  { %v787_v38 = vcombine.low %v735_v59, %v737_v35  ;;  %v788_v39 = vcombine.low %v776_v28, %v778_v37  ;;  %v739_v40 = vpop.f32.mrb[14].mxu0  ;;  %v780_v41 = vpop.f32.mrb[14].mxu1 }
 0x439   :  { %v740_v42 = vpop.f32.mrb[15].mxu0  ;;  %v781_v43 = vpop.f32.mrb[15].mxu1 }
 0x43a   :  { %v795_v44 = vrot.slane %v787_v38, %v1828_v63  ;;  %v802_v45 = vrot.slane %v788_v39, %v1828_v63 }
 0x43c   :  { %v803_v46 = vcombine.low %v795_v44, %v802_v45 }
 0x43e   :  { %v810_v47 = vrot.slane %v803_v46, %v1828_v63 }
 0x440   :  { %v812_v36 = vadd.f32 %v810_v47, %v699_v48 }
 0x442   :  { %v1433_v49 = vmul.f32 -1.442695, %v812_v36  ;;  %v820_v52 = vrot.slane %v812_v36, 3 }
 0x444   :  { %1517 = vpow2.f32 %v1433_v49 }
 0x44e   :  { %v1518_v50 = vpop.eup %1517 }
 0x44f   :  { %v816_v51 = vadd.f32 1.0, %v1518_v50 }
 0x451   :  { %1519 = vrcp.f32 %v816_v51 }
 0x452   :  { %1521 = vtanh.f32 %v820_v52 }
 0x45b   :  { %v1520_v53 = vpop.eup %1519 }
 0x45c   :  { %v824_v54 = vrot.slane %v1520_v53, 1  ;;  %v1522_v55 = vpop.eup %1521  ;;  %v830_v62 = vrot.slane %v1520_v53, 2 }
 0x45d   :  { %v827_v56 = vmul.f32 %v1522_v55, %v1520_v53 }
 0x45e   :  { %v826_v57 = vmul.f32 %v824_v54, %v1915_v60 }
 0x460   :  { %v1956_v61 = vadd.f32 %v827_v56, %v826_v57 }
 0x462   :  { %1523 = vtanh.f32 %v1956_v61 }
 0x46c   :  { %v1524_v0 = vpop.eup %1523 }
 0x46d   :  { %v832_v58 = vmul.f32 %v1524_v0, %v830_v62 }
 0x46f   :  { %v835_v59 = vpack.c.bf16 %v832_v58, %v832_v58 }
 0x471   :  { %869 = vmatmul.mubr.bf16.vlgmr.msra.gmra.mrb[16].mxu0 %v835_v59  ;;  %910 = vmatmul.mubr.bf16.vlgmr.msra.gmra.mrb[16].mxu1 %v835_v59 }
 0x472   :  { %972 = vmatpush1.bf16.msra.mxu0 %v1690_v4  ;;  %1013 = vmatpush1.bf16.msra.mxu1 %v1692_v5 }
 0x473   :  { %973 = vmatprep.subr.bf16.mxu0 %v1695_v6  ;;  %1014 = vmatprep.subr.bf16.mxu1 %v1699_v7 }
 0x474   :  { %1003 = vmatprep.mubr.bf16.mxu0 %v1629_v1  ;;  %1044 = vmatprep.mubr.bf16.mxu1 %v1629_v1 }
 0x476   :  { %974 = vmatpush1.bf16.msra.mxu0 %v1701_v8  ;;  %1015 = vmatpush1.bf16.msra.mxu1 %v1704_v9 }
 0x477   :  { %975 = vmatprep.subr.bf16.mxu0 %v1707_v10  ;;  %1016 = vmatprep.subr.bf16.mxu1 %v1709_v11 }
 0x47a   :  { %976 = vmatpush1.bf16.msra.mxu0 %v1711_v12  ;;  %1017 = vmatpush1.bf16.msra.mxu1 %v1713_v13 }
 0x47b   :  { %977 = vmatprep.subr.bf16.mxu0 %v1717_v14  ;;  %1018 = vmatprep.subr.bf16.mxu1 %v1721_v15 }
 0x47e   :  { %978 = vmatpush1.bf16.msra.mxu0 %v1723_v16  ;;  %1019 = vmatpush1.bf16.msra.mxu1 %v1727_v17 }
 0x47f   :  { %979 = vmatprep.subr.bf16.mxu0 %v1729_v18  ;;  %1020 = vmatprep.subr.bf16.mxu1 %v1733_v19 }
 0x482   :  { %980 = vmatpush1.bf16.msra.mxu0 %v1735_v20  ;;  %1021 = vmatpush1.bf16.msra.mxu1 %v1737_v21 }
 0x483   :  { %981 = vmatprep.subr.bf16.mxu0 %v1741_v22  ;;  %1022 = vmatprep.subr.bf16.mxu1 %v1745_v23 }
 0x486   :  { %982 = vmatpush1.bf16.msra.mxu0 %v1749_v24  ;;  %1023 = vmatpush1.bf16.msra.mxu1 %v1751_v25 }
 0x487   :  { %983 = vmatprep.subr.bf16.mxu0 %v1755_v26  ;;  %1024 = vmatprep.subr.bf16.mxu1 %v1757_v27 }
 0x48a   :  { %984 = vmatpush1.bf16.msra.mxu0 %v1764_v29  ;;  %1025 = vmatpush1.bf16.msra.mxu1 %v1766_v30 }
 0x48b   :  { %985 = vmatprep.subr.bf16.mxu0 %v1770_v31  ;;  %1026 = vmatprep.subr.bf16.mxu1 %v1772_v32 }
 0x48e   :  { %986 = vmatpush1.bf16.msra.mxu0 %v1776_v33  ;;  %1027 = vmatpush1.bf16.msra.mxu1 %v1778_v34 }
 0x48f   :  { %1106 = vmatprep.subr.bf16.mxu0 %v1685_v2  ;;  %1147 = vmatprep.subr.bf16.mxu1 %v1687_v3  ;;  %v834_v2 = vld [vmem:[#allocation2 + $0x4] ss:$8 sm:$0xf] }
 0x544   :  { %v870_v60 = vpop.f32.mrb[16].mxu0  ;;  %v911_v28 = vpop.f32.mrb[16].mxu1 }
 0x545   :  { %v872_v35 = vpop.f32.mrb[17].mxu0  ;;  %v913_v37 = vpop.f32.mrb[17].mxu1 }
 0x546   :  { %v922_v38 = vcombine.low %v870_v60, %v872_v35  ;;  %v923_v39 = vcombine.low %v911_v28, %v913_v37  ;;  %v874_v40 = vpop.f32.mrb[18].mxu0  ;;  %v915_v41 = vpop.f32.mrb[18].mxu1 }
 0x547   :  { %v875_v42 = vpop.f32.mrb[19].mxu0  ;;  %v916_v43 = vpop.f32.mrb[19].mxu1 }
 0x548   :  { %v930_v44 = vrot.slane %v922_v38, %v1828_v63  ;;  %v937_v45 = vrot.slane %v923_v39, %v1828_v63 }
 0x54a   :  { %v938_v46 = vcombine.low %v930_v44, %v937_v45  ;;  %v1559_v45 = vld [vmem:[#allocation4] ss:$16 sps:$4 sm:$0xff]  }
 0x54c   :  { %v945_v47 = vrot.slane %v938_v46, %v1828_v63  ;;  %v1560_v46 = vld [vmem:[#allocation4 + $0x8] ss:$16 sps:$4 sm:$0xff]  }
 0x54e   :  { %v947_v48 = vadd.f32 %v945_v47, %v834_v2  ;;  %v1561_v47 = vld [vmem:[#allocation4 + $0x24] ss:$16 sps:$4 sm:$0xff]   ;;  %v1562_v2 = vld [vmem:[#allocation4 + $0x2c] ss:$16 sps:$4 sm:$0xff]  }
 0x550   :  { %v1434_v3 = vmul.f32 -1.442695, %v947_v48  ;;  %v955_v50 = vrot.slane %v947_v48, 3  ;;  %v1563_v48 = vld [vmem:[#allocation4 + $0x20] ss:$16 sps:$4 sm:$0xff]  }
 0x552   :  { %1525 = vpow2.f32 %v1434_v3  ;;  %v1564_v3 = vld [vmem:[#allocation4 + $0x28] ss:$16 sps:$4 sm:$0xff]  }
 0x55c   :  { %v1526_v36 = vpop.eup %1525 }
 0x55d   :  { %v951_v49 = vadd.f32 1.0, %v1526_v36  ;;  %v1565_v36 = vld [vmem:[#allocation4 + $0x44] ss:$16 sps:$4 sm:$0xff]  }
 0x55f   :  { %1527 = vrcp.f32 %v951_v49  ;;  %v1566_v49 = vld [vmem:[#allocation4 + $0x4c] ss:$16 sps:$4 sm:$0xff]  }
 0x560   :  { %1529 = vtanh.f32 %v955_v50  ;;  %v1567_v50 = vld [vmem:[#allocation4 + $0x40] ss:$16 sps:$4 sm:$0xff]  }
 0x569   :  { %v1528_v51 = vpop.eup %1527 }
 0x56a   :  { %v959_v52 = vrot.slane %v1528_v51, 1  ;;  %v1530_v53 = vpop.eup %1529  ;;  %v965_v57 = vrot.slane %v1528_v51, 2 }
 0x56b   :  { %v962_v54 = vmul.f32 %v1530_v53, %v1528_v51  ;;  %v1568_v51 = vld [vmem:[#allocation4 + $0x48] ss:$16 sps:$4 sm:$0xff]   ;;  %v1570_v53 = vld [vmem:[#allocation4 + $0x6c] ss:$16 sps:$4 sm:$0xff]  }
 0x56c   :  { %v961_v55 = vmul.f32 %v959_v52, %v1956_v61  ;;  %v1569_v52 = vld [vmem:[#allocation4 + $0x64] ss:$16 sps:$4 sm:$0xff]  }
 0x56e   :  { %v1997_v56 = vadd.f32 %v962_v54, %v961_v55  ;;  %v1571_v54 = vld [vmem:[#allocation4 + $0x60] ss:$16 sps:$4 sm:$0xff]   ;;  %v1572_v55 = vld [vmem:[#allocation4 + $0x68] ss:$16 sps:$4 sm:$0xff]  }
 0x570   :  { %1531 = vtanh.f32 %v1997_v56 }
 0x57a   :  { %v1532_v62 = vpop.eup %1531 }
 0x57b   :  { %v967_v0 = vmul.f32 %v1532_v62, %v965_v57  ;;  %v1575_v57 = vld [vmem:[#allocation4 + $0x80] ss:$16 sps:$4 sm:$0xff]   ;;  %v1576_v62 = vld [vmem:[#allocation4 + $0x88] ss:$16 sps:$4 sm:$0xff]  }
 0x57d   :  { %v970_v58 = vpack.c.bf16 %v967_v0, %v967_v0  ;;  %v1577_v0 = vld [vmem:[#allocation4 + $0xa4] ss:$16 sps:$4 sm:$0xff]  }
 0x57f   :  { %1004 = vmatmul.mubr.bf16.vlgmr.msra.gmra.mrb[20].mxu0 %v970_v58  ;;  %1045 = vmatmul.mubr.bf16.vlgmr.msra.gmra.mrb[20].mxu1 %v970_v58 }
 0x580   :  { %1107 = vmatpush1.bf16.msra.mxu0 %v1690_v4  ;;  %1148 = vmatpush1.bf16.msra.mxu1 %v1692_v5  ;;  %v1557_v4 = vld [vmem:[#allocation4 + $0x4] ss:$16 sps:$4 sm:$0xff]   ;;  %v1558_v5 = vld [vmem:[#allocation4 + $0xc] ss:$16 sps:$4 sm:$0xff]  }
 0x581   :  { %1108 = vmatprep.subr.bf16.mxu0 %v1695_v6  ;;  %1149 = vmatprep.subr.bf16.mxu1 %v1699_v7 }
 0x582   :  { %1138 = vmatprep.mubr.bf16.mxu0 %v1629_v1  ;;  %1179 = vmatprep.mubr.bf16.mxu1 %v1629_v1 }
 0x584   :  { %1109 = vmatpush1.bf16.msra.mxu0 %v1701_v8  ;;  %1150 = vmatpush1.bf16.msra.mxu1 %v1704_v9 }
 0x585   :  { %1110 = vmatprep.subr.bf16.mxu0 %v1707_v10  ;;  %1151 = vmatprep.subr.bf16.mxu1 %v1709_v11 }
 0x588   :  { %1111 = vmatpush1.bf16.msra.mxu0 %v1711_v12  ;;  %1152 = vmatpush1.bf16.msra.mxu1 %v1713_v13 }
 0x589   :  { %1112 = vmatprep.subr.bf16.mxu0 %v1717_v14  ;;  %1153 = vmatprep.subr.bf16.mxu1 %v1721_v15 }
 0x58c   :  { %1113 = vmatpush1.bf16.msra.mxu0 %v1723_v16  ;;  %1154 = vmatpush1.bf16.msra.mxu1 %v1727_v17 }
 0x58d   :  { %1114 = vmatprep.subr.bf16.mxu0 %v1729_v18  ;;  %1155 = vmatprep.subr.bf16.mxu1 %v1733_v19 }
 0x590   :  { %1115 = vmatpush1.bf16.msra.mxu0 %v1735_v20  ;;  %1156 = vmatpush1.bf16.msra.mxu1 %v1737_v21  ;;  %v969_v20 = vld [vmem:[#allocation2 + $0x5] ss:$8 sm:$0xf] }
 0x591   :  { %1116 = vmatprep.subr.bf16.mxu0 %v1741_v22  ;;  %1157 = vmatprep.subr.bf16.mxu1 %v1745_v23 }
 0x594   :  { %1117 = vmatpush1.bf16.msra.mxu0 %v1749_v24  ;;  %1158 = vmatpush1.bf16.msra.mxu1 %v1751_v25 }
 0x595   :  { %1118 = vmatprep.subr.bf16.mxu0 %v1755_v26  ;;  %1159 = vmatprep.subr.bf16.mxu1 %v1757_v27 }
 0x598   :  { %1119 = vmatpush1.bf16.msra.mxu0 %v1764_v29  ;;  %1160 = vmatpush1.bf16.msra.mxu1 %v1766_v30 }
 0x599   :  { %1120 = vmatprep.subr.bf16.mxu0 %v1770_v31  ;;  %1161 = vmatprep.subr.bf16.mxu1 %v1772_v32 }
 0x59c   :  { %1121 = vmatpush1.bf16.msra.mxu0 %v1776_v33  ;;  %1162 = vmatpush1.bf16.msra.mxu1 %v1778_v34 }
 0x59d   :  { %1241 = vmatprep.subr.bf16.mxu0 %v1557_v4  ;;  %1282 = vmatprep.subr.bf16.mxu1 %v1558_v5 }
 0x652   :  { %v1005_v6 = vpop.f32.mrb[20].mxu0  ;;  %v1046_v7 = vpop.f32.mrb[20].mxu1 }
 0x653   :  { %v1007_v8 = vpop.f32.mrb[21].mxu0  ;;  %v1048_v9 = vpop.f32.mrb[21].mxu1 }
 0x654   :  { %v1057_v10 = vcombine.low %v1005_v6, %v1007_v8  ;;  %v1058_v11 = vcombine.low %v1046_v7, %v1048_v9  ;;  %v1009_v12 = vpop.f32.mrb[22].mxu0  ;;  %v1050_v13 = vpop.f32.mrb[22].mxu1 }
 0x655   :  { %v1010_v14 = vpop.f32.mrb[23].mxu0  ;;  %v1051_v15 = vpop.f32.mrb[23].mxu1 }
 0x656   :  { %v1065_v16 = vrot.slane %v1057_v10, %v1828_v63  ;;  %v1072_v17 = vrot.slane %v1058_v11, %v1828_v63 }
 0x658   :  { %v1073_v18 = vcombine.low %v1065_v16, %v1072_v17 }
 0x65a   :  { %v1080_v19 = vrot.slane %v1073_v18, %v1828_v63 }
 0x65c   :  { %v1082_v21 = vadd.f32 %v1080_v19, %v969_v20 }
 0x65e   :  { %v1435_v22 = vmul.f32 -1.442695, %v1082_v21  ;;  %v1090_v60 = vrot.slane %v1082_v21, 3 }
 0x660   :  { %1533 = vpow2.f32 %v1435_v22 }
 0x66a   :  { %v1534_v61 = vpop.eup %1533 }
 0x66b   :  { %v1086_v59 = vadd.f32 1.0, %v1534_v61 }
 0x66d   :  { %1535 = vrcp.f32 %v1086_v59 }
 0x66e   :  { %1537 = vtanh.f32 %v1090_v60 }
 0x677   :  { %v1536_v28 = vpop.eup %1535 }
 0x678   :  { %v1094_v35 = vrot.slane %v1536_v28, 1  ;;  %v1538_v37 = vpop.eup %1537  ;;  %v1100_v41 = vrot.slane %v1536_v28, 2 }
 0x679   :  { %v1097_v38 = vmul.f32 %v1538_v37, %v1536_v28 }
 0x67a   :  { %v1096_v39 = vmul.f32 %v1094_v35, %v1997_v56  ;;  %v1574_v56 = vld [vmem:[#allocation4 + $0x8c] ss:$16 sps:$4 sm:$0xff]  }
 0x67c   :  { %v2036_v40 = vadd.f32 %v1097_v38, %v1096_v39 }
 0x67e   :  { %1539 = vtanh.f32 %v2036_v40 }
 0x688   :  { %v1540_v42 = vpop.eup %1539 }
 0x689   :  { %v1102_v43 = vmul.f32 %v1540_v42, %v1100_v41 }
 0x68b   :  { %v1105_v44 = vpack.c.bf16 %v1102_v43, %v1102_v43 }
 0x68d   :  { %1139 = vmatmul.mubr.bf16.vlgmr.msra.gmra.mrb[24].mxu0 %v1105_v44  ;;  %1180 = vmatmul.mubr.bf16.vlgmr.msra.gmra.mrb[24].mxu1 %v1105_v44 }
 0x68e   :  { %1242 = vmatpush1.bf16.msra.mxu0 %v1559_v45  ;;  %1283 = vmatpush1.bf16.msra.mxu1 %v1560_v46  ;;  %v1239_v45 = vld [vmem:[#allocation2 + $0x7] ss:$8 sm:$0xf] }
 0x68f   :  { %1243 = vmatprep.subr.bf16.mxu0 %v1561_v47  ;;  %1284 = vmatprep.subr.bf16.mxu1 %v1562_v2 }
 0x690   :  { %1273 = vmatprep.mubr.bf16.mxu0 %v1629_v1  ;;  %1314 = vmatprep.mubr.bf16.mxu1 %v1629_v1  ;;  %v1573_v1 = vld [vmem:[#allocation4 + $0x84] ss:$16 sps:$4 sm:$0xff]  }
 0x692   :  { %1244 = vmatpush1.bf16.msra.mxu0 %v1563_v48  ;;  %1285 = vmatpush1.bf16.msra.mxu1 %v1564_v3 }
 0x693   :  { %1245 = vmatprep.subr.bf16.mxu0 %v1565_v36  ;;  %1286 = vmatprep.subr.bf16.mxu1 %v1566_v49 }
 0x696   :  { %1246 = vmatpush1.bf16.msra.mxu0 %v1567_v50  ;;  %1287 = vmatpush1.bf16.msra.mxu1 %v1568_v51 }
 0x697   :  { %1247 = vmatprep.subr.bf16.mxu0 %v1569_v52  ;;  %1288 = vmatprep.subr.bf16.mxu1 %v1570_v53 }
 0x69a   :  { %1248 = vmatpush1.bf16.msra.mxu0 %v1571_v54  ;;  %1289 = vmatpush1.bf16.msra.mxu1 %v1572_v55 }
 0x69b   :  { %1249 = vmatprep.subr.bf16.mxu0 %v1573_v1  ;;  %1290 = vmatprep.subr.bf16.mxu1 %v1574_v56 }
 0x69e   :  { %1250 = vmatpush1.bf16.msra.mxu0 %v1575_v57  ;;  %1291 = vmatpush1.bf16.msra.mxu1 %v1576_v62  ;;  %v1379_v62 = vld [vmem:[#allocation3] sm:$0x1] }
 0x69f   :  { %1251 = vmatprep.subr.bf16.mxu0 %v1577_v0  ;;  %1292 = vmatprep.subr.bf16.mxu1 %v1745_v23 }
 0x6a2   :  { %1252 = vmatpush1.bf16.msra.mxu0 %v1749_v24  ;;  %1293 = vmatpush1.bf16.msra.mxu1 %v1751_v25 }
 0x6a3   :  { %1253 = vmatprep.subr.bf16.mxu0 %v1755_v26  ;;  %1294 = vmatprep.subr.bf16.mxu1 %v1757_v27 }
 0x6a6   :  { %1254 = vmatpush1.bf16.msra.mxu0 %v1764_v29  ;;  %1295 = vmatpush1.bf16.msra.mxu1 %v1766_v30 }
 0x6a7   :  { %1255 = vmatprep.subr.bf16.mxu0 %v1770_v31  ;;  %1296 = vmatprep.subr.bf16.mxu1 %v1772_v32 }
 0x6aa   :  { %1256 = vmatpush1.bf16.msra.mxu0 %v1776_v33  ;;  %1297 = vmatpush1.bf16.msra.mxu1 %v1778_v34  ;;  %v1104_v33 = vld [vmem:[#allocation2 + $0x6] ss:$8 sm:$0xf] }
 0x760   :  { %v1140_v23 = vpop.f32.mrb[24].mxu0  ;;  %v1181_v24 = vpop.f32.mrb[24].mxu1 }
 0x761   :  { %v1142_v58 = vpop.f32.mrb[25].mxu0  ;;  %v1183_v25 = vpop.f32.mrb[25].mxu1 }
 0x762   :  { %v1192_v4 = vcombine.low %v1140_v23, %v1142_v58  ;;  %v1193_v26 = vcombine.low %v1181_v24, %v1183_v25  ;;  %v1144_v5 = vpop.f32.mrb[26].mxu0  ;;  %v1185_v27 = vpop.f32.mrb[26].mxu1 }
 0x763   :  { %v1145_v6 = vpop.f32.mrb[27].mxu0  ;;  %v1186_v29 = vpop.f32.mrb[27].mxu1 }
 0x764   :  { %v1200_v30 = vrot.slane %v1192_v4, %v1828_v63  ;;  %v1207_v31 = vrot.slane %v1193_v26, %v1828_v63 }
 0x766   :  { %v1208_v7 = vcombine.low %v1200_v30, %v1207_v31 }
 0x768   :  { %v1215_v32 = vrot.slane %v1208_v7, %v1828_v63 }
 0x76a   :  { %v1217_v8 = vadd.f32 %v1215_v32, %v1104_v33 }
 0x76c   :  { %v1436_v34 = vmul.f32 -1.442695, %v1217_v8  ;;  %v1225_v11 = vrot.slane %v1217_v8, 3 }
 0x76e   :  { %1541 = vpow2.f32 %v1436_v34 }
 0x778   :  { %v1542_v9 = vpop.eup %1541 }
 0x779   :  { %v1221_v10 = vadd.f32 1.0, %v1542_v9 }
 0x77b   :  { %1543 = vrcp.f32 %v1221_v10 }
 0x77c   :  { %1545 = vtanh.f32 %v1225_v11 }
 0x785   :  { %v1544_v12 = vpop.eup %1543 }
 0x786   :  { %v1229_v13 = vrot.slane %v1544_v12, 1  ;;  %v1546_v14 = vpop.eup %1545  ;;  %v1235_v18 = vrot.slane %v1544_v12, 2 }
 0x787   :  { %v1232_v15 = vmul.f32 %v1546_v14, %v1544_v12 }
 0x788   :  { %v1231_v16 = vmul.f32 %v1229_v13, %v2036_v40 }
 0x78a   :  { %v1233_v17 = vadd.f32 %v1232_v15, %v1231_v16 }
 0x78c   :  { %1547 = vtanh.f32 %v1233_v17 }
 0x796   :  { %v1548_v19 = vpop.eup %1547 }
 0x797   :  { %v1237_v20 = vmul.f32 %v1548_v19, %v1235_v18 }
 0x799   :  { %v1240_v21 = vpack.c.bf16 %v1237_v20, %v1237_v20 }
 0x79b   :  { %1274 = vmatmul.mubr.bf16.vlgmr.msra.gmra.mrb[28].mxu0 %v1240_v21  ;;  %1315 = vmatmul.mubr.bf16.vlgmr.msra.gmra.mrb[28].mxu1 %v1240_v21 }
 0x86e   :  { %v1275_v22 = vpop.f32.mrb[28].mxu0  ;;  %v1316_v61 = vpop.f32.mrb[28].mxu1 }
 0x86f   :  { %v1277_v59 = vpop.f32.mrb[29].mxu0  ;;  %v1318_v60 = vpop.f32.mrb[29].mxu1 }
 0x870   :  { %v1327_v28 = vcombine.low %v1275_v22, %v1277_v59  ;;  %v1328_v35 = vcombine.low %v1316_v61, %v1318_v60  ;;  %v1279_v37 = vpop.f32.mrb[30].mxu0  ;;  %v1320_v38 = vpop.f32.mrb[30].mxu1 }
 0x871   :  { %v1280_v39 = vpop.f32.mrb[31].mxu0  ;;  %v1321_v41 = vpop.f32.mrb[31].mxu1 }
 0x872   :  { %v1335_v40 = vrot.slane %v1327_v28, %v1828_v63  ;;  %v1342_v42 = vrot.slane %v1328_v35, %v1828_v63 }
 0x874   :  { %v1343_v43 = vcombine.low %v1335_v40, %v1342_v42 }
 0x876   :  { %v1350_v44 = vrot.slane %v1343_v43, %v1828_v63  ;;  %v1373_v63 = vld [vmem:[%s2078_s4] sm:$0x1] }
 0x878   :  { %v1352_v46 = vadd.f32 %v1350_v44, %v1239_v45 }
 0x87a   :  { %v1437_v47 = vmul.f32 -1.442695, %v1352_v46  ;;  %v1360_v3 = vrot.slane %v1352_v46, 3 }
 0x87c   :  { %1549 = vpow2.f32 %v1437_v47 }
 0x886   :  { %v1550_v2 = vpop.eup %1549 }
 0x887   :  { %v1356_v48 = vadd.f32 1.0, %v1550_v2 }
 0x889   :  { %1551 = vrcp.f32 %v1356_v48 }
 0x88a   :  { %1553 = vtanh.f32 %v1360_v3 }
 0x893   :  { %v1552_v36 = vpop.eup %1551 }
 0x894   :  { %v1364_v49 = vrot.slane %v1552_v36, 1  ;;  %v1554_v50 = vpop.eup %1553  ;;  %v1370_v54 = vrot.slane %v1552_v36, 2 }
 0x895   :  { %v1367_v52 = vmul.f32 %v1554_v50, %v1552_v36 }
 0x896   :  { %v1366_v51 = vmul.f32 %v1364_v49, %v1233_v17 }
 0x898   :  { %v1368_v53 = vadd.f32 %v1367_v52, %v1366_v51 }
 0x89a   :  { %1555 = vtanh.f32 %v1368_v53 }
 0x8a4   :  { %v1556_v55 = vpop.eup %1555 }
 0x8a5   :  { %v1372_v1 = vmul.f32 %v1556_v55, %v1370_v54 }
 0x8a7   :  { %v1374_v56 = vmul.f32 %v1373_v63, %v1372_v1 }
 0x8a9   :  { %v1376_v57 = vsel %vm1375_vm0, %v1374_v56, 0.0 }
 0x8aa   :  { %1377 = vadd.xlane.f32.xlu0 %v1376_v57 }
 0x937   :  { %v1378_v0 = vpop.xlane.xlu0 %1377 }
 0x938   :  { %v1380_v23 = vadd.f32 %v1379_v62, %v1378_v0 }
 0x93a   :  { %1382 = vst.msk [vmem:[#allocation7] sm:$0x1] %vm1381_vm1, %v1380_v23 }
 0x93b   :  { %1611 = shalt.err (!%p1608_p12)
}
 0x93c   :  { %s1612_s21 = scalar_lea.hbm %s2080_s6, 16 }
 0x93d   :  { %p1613_p13 = scmp.ne.s32.totalorder %s2080_s6, %s1612_s21  ;;  %p1616_p0 = scmp.lt.u32.totalorder %s1612_s21, %s2080_s6 }
 0x93f   :  { %p1618_p1 = pnand %p1616_p0, %p1613_p13 }
 0x941   :  { %1621 = shalt.err (!%p1618_p1)
}
 0x942   :  { %1392 = dma.vmem_to_hbm [thread:$0]  %s1390_s17, 16, %s2080_s6, [#allocation6]  }
 0x943   :  { %1624 = dma.done.wait [#allocation6], 16  }
 0x944   :  { %1625 = vsyncadd [#allocation6], 4294967280 }
 0x945   :  { %1396 = vsyncpa [#allocation5], 1 }
 0x946   :  { %1397 = vsyncpa [#allocation6], 1 }

</bundles_post_ra>
